<compile_context>
chip_gen: v5e
topology: v5e:2x2
jax: 0.10.0
libtpu: 0.0.40
codegen_flags: <defaults>
</compile_context>

<pallas_src>
import functools

import jax
import jax.numpy as jnp
import numpy as np
from jax.experimental import pallas as pl
from jax.experimental.pallas import tpu as pltpu


# ---------------------------------------------------------------------------
# Structural constants (pure numpy -> baked in at trace time, zero runtime cost).
# ---------------------------------------------------------------------------
def _gc_gather_matrices(H, W, Ho, Wo, nb):
    """(nb, 9, H*W, L) 0/1 matrices with L = nb*Ho*Wo.

    x_img_n (C, H*W) @ G[n, kh*3+kw] places the stride-2, pad-1 tap (kh, kw) of image n
    at output lane n*Ho*Wo + ho*Wo + wo.  Out-of-range taps (the zero padding) are
    simply all-zero columns, so no jnp.pad is needed anywhere.
    """
    L = nb * Ho * Wo
    G = np.zeros((nb, 9, H * W, L), np.float32)
    for n in range(nb):
        for kh in range(3):
            for kw in range(3):
                k = kh * 3 + kw
                for ho in range(Ho):
                    hi = 2 * ho + kh - 1
                    if not (0 <= hi < H):
                        continue
                    for wo in range(Wo):
                        wi = 2 * wo + kw - 1
                        if not (0 <= wi < W):
                            continue
                        G[n, k, hi * W + wi, n * Ho * Wo + ho * Wo + wo] = 1.0
    return G


def _shift_matrices(Ho, Wo, nb):
    """(4, L, L) 0/1 matrices: right-multiplying a channels-first (C, L) map yields the
    'same'-padded left/right/up/down neighbour values.  Block-diagonal over the nb
    images packed into the lane dimension (lane = n*Ho*Wo + h*Wo + w)."""
    L = nb * Ho * Wo
    dst = np.arange(L)
    w = dst % Wo
    h = (dst // Wo) % Ho
    S = np.zeros((4, L, L), np.float32)
    m = w > 0
    S[0, dst[m] - 1, dst[m]] = 1.0        # value of (h, w-1)
    m = w < Wo - 1
    S[1, dst[m] + 1, dst[m]] = 1.0        # value of (h, w+1)
    m = h > 0
    S[2, dst[m] - Wo, dst[m]] = 1.0       # value of (h-1, w)
    m = h < Ho - 1
    S[3, dst[m] + Wo, dst[m]] = 1.0       # value of (h+1, w)
    return S


# ---------------------------------------------------------------------------
# The fused kernel: gc -> fif_a (+ residual) -> fif_b, all in VMEM/vregs.
# ---------------------------------------------------------------------------
def _fused_kernel(x_ref, ggc_ref, wgc_ref, bgc_ref, s_ref, fw_ref, fb_ref, o_ref,
                  *, nb, mxu_dtype):
    """Ref shapes (per grid step, L = nb*Ho*Wo lanes):
    x_ref  : (nb, C, H*W)      f32   input images (NCHW with HW flattened, free reshape)
    ggc_ref: (nb, 9, H*W, L)   bf16  0/1 gather matrices (stride-2 taps, zero pad folded)
    wgc_ref: (9, C, 1)         f32   depthwise 3x3 tap weights, k = kh*3 + kw
    bgc_ref: (C, 1)            f32
    s_ref  : (4, L, L)         bf16  block-diag shift matrices [left, right, up, down]
    fw_ref : (2, 9, C, C)      bf16  packed FiFBLock matmul weights (pack_fif_block_params)
    fb_ref : (2, 5, C, 1)      f32   packed FiFBLock bias / clamp-cap columns
    o_ref  : (C, L)            f32   channels-first, lane-dense output
    """
    f32 = jnp.float32
    C, L = o_ref.shape

    def mm(a, b):                       # MXU matmul, f32 accumulation
        return jnp.dot(a, b, preferred_element_type=f32)

    # ---- Stage 1: "gc" depthwise 3x3, stride 2, pad 1, + Hardtanh(0, 3) -----------
    # Each strided tap is a matmul against a constant 0/1 gather matrix, so the result
    # lands directly in the lane-dense channels-first (C, L) layout used below.
    xm = [x_ref[n].astype(mxu_dtype) for n in range(nb)]
    acc = jnp.zeros((C, L), f32)
    for k in range(9):
        tap = mm(xm[0], ggc_ref[0, k])
        for n in range(1, nb):
            tap = tap + mm(xm[n], ggc_ref[n, k])
        acc = acc + wgc_ref[k] * tap                  # per-channel tap weight (VPU)
    y = jnp.clip(acc + bgc_ref[...], 0.0, 3.0)        # (C, L) f32

    # ---- Stage 2 & 3: the two FiFBLocks --------------------------------------------
    def fif_block(xin, blk):
        w = lambda i: fw_ref[blk, i]                  # (C, C) matmul weight
        b = lambda i: fb_ref[blk, i]                  # (C, 1) bias / cap column
        # fused conv_a/conv_b 1x1 + ReLU -> [x1; x2] stacked (C, L)
        xs = jax.nn.relu(mm(w(0), xin.astype(mxu_dtype)) + b(0))
        xsm = xs.astype(mxu_dtype)
        # 'same'-padded +/-1 neighbours via shift matmuls, shared by the x1/x2 halves
        xl = mm(xsm, s_ref[0]).astype(mxu_dtype)
        xr = mm(xsm, s_ref[1]).astype(mxu_dtype)
        xu = mm(xsm, s_ref[2]).astype(mxu_dtype)
        xd = mm(xsm, s_ref[3]).astype(mxu_dtype)
        # block-diag taps: rows 0:Ch = depthwise (1,3)/(3,1), rows Ch:2Ch = full convs
        y13 = mm(w(1), xl) + mm(w(2), xsm) + mm(w(3), xr) + b(1)
        y31 = mm(w(4), xu) + mm(w(5), xsm) + mm(w(6), xd) + b(2)
        cap = b(3)                                    # 3.0 (Hardtanh rows) / FLT_MAX (ReLU rows)
        h13 = jnp.minimum(jnp.maximum(y13, 0.0), cap) # [x11; x21]
        h31 = jnp.minimum(jnp.maximum(y31, 0.0), cap) # [x12; x22]
        # end 1x1 convs + channel concat as two block-diagonal matmuls
        return jax.nn.relu(mm(w(7), h13.astype(mxu_dtype))
                           + mm(w(8), h31.astype(mxu_dtype)) + b(4))

    y = fif_block(y, 0) + y                           # fif_a(y) + y (residual fused)
    y = fif_block(y, 1)                               # fif_b(y)
    o_ref[...] = y.astype(o_ref.dtype)


# ---------------------------------------------------------------------------
# Wrapper.
# ---------------------------------------------------------------------------
_VMEM_LIMIT = 32 * 1024 * 1024


def fif_module_forward(x_nchw, params, *, images_per_block=None,
                       mxu_dtype=jnp.bfloat16):
    """FiFModule forward: gc_act(gc(x)); y = fif_a(y)+y; y = fif_b(y). Returns NCHW."""
    N, C, H, W = x_nchw.shape
    Ho = (H + 2 - 3) // 2 + 1
    Wo = (W + 2 - 3) // 2 + 1
    HW = Ho * Wo

    nb = images_per_block
    if nb is None:
        nb = min(N, max(1, -(-128 // HW)))   # pack enough images for >=128 lanes
        while N % nb:
            nb -= 1
    assert N % nb == 0, "batch must be divisible by images_per_block"
    L = nb * HW

    # Structural constants (numpy at trace time -> compile-time constants).
    G = jnp.asarray(_gc_gather_matrices(H, W, Ho, Wo, nb), dtype=mxu_dtype)
    S = jnp.asarray(_shift_matrices(Ho, Wo, nb), dtype=mxu_dtype)

    gc_w = params["gc_w"].astype(jnp.float32)          # (9, C, 1)
    gc_b = params["gc_b"].astype(jnp.float32)          # (C, 1)
    fif_w = params["fif_w"].astype(mxu_dtype)          # (2, 9, C, C)
    fif_b = params["fif_b"].astype(jnp.float32)        # (2, 5, C, 1)

    x_flat = x_nchw.reshape(N, C, H * W).astype(jnp.float32)   # free row-major reshape

    kernel = functools.partial(_fused_kernel, nb=nb, mxu_dtype=mxu_dtype)
    out_cf = pl.pallas_call(
        kernel,
        out_shape=jax.ShapeDtypeStruct((C, N * HW), jnp.float32),
        grid=(N // nb,),
        in_specs=[
            pl.BlockSpec((nb, C, H * W), lambda g: (g, 0, 0)),   # per-block images
            pl.BlockSpec(G.shape, lambda g: (0, 0, 0, 0)),       # resident constants:
            pl.BlockSpec(gc_w.shape, lambda g: (0, 0, 0)),       #   DMA'd once across grid
            pl.BlockSpec(gc_b.shape, lambda g: (0, 0)),
            pl.BlockSpec(S.shape, lambda g: (0, 0, 0)),
            pl.BlockSpec(fif_w.shape, lambda g: (0, 0, 0, 0)),
            pl.BlockSpec(fif_b.shape, lambda g: (0, 0, 0, 0)),
        ],
        out_specs=pl.BlockSpec((C, L), lambda g: (0, g)),        # lane-dense stores
        compiler_params=pltpu.CompilerParams(
            dimension_semantics=("parallel",),   # batch blocks shard across TCs (v7x)
            vmem_limit_bytes=_VMEM_LIMIT),
    )(x_flat, G, gc_w, gc_b, S, fif_w, fif_b)

    # (C, N*Ho*Wo) lane-dense -> the module's NCHW contract (tiny ~4 KiB relayout).
    return out_cf.reshape(C, N, Ho, Wo).transpose(1, 0, 2, 3)


# ---------------------------------------------------------------------------
# Parameter generation (PyTorch conv layouts) and packing into kernel layouts.
# ---------------------------------------------------------------------------
def init_fif_block_torch_params(key, c_in, c_hid):
    ks = jax.random.split(key, 16)
    r = lambda k, s: jax.random.normal(k, s, jnp.float32) * 0.1
    return dict(
        conv_a_w=r(ks[0], (c_hid, c_in, 1, 1)), conv_a_b=r(ks[1], (c_hid,)),
        conv_b_w=r(ks[2], (c_hid, c_in, 1, 1)), conv_b_b=r(ks[3], (c_hid,)),
        gc_13_w=r(ks[4], (c_hid, 1, 1, 3)), gc_13_b=r(ks[5], (c_hid,)),
        gc_31_w=r(ks[6], (c_hid, 1, 3, 1)), gc_31_b=r(ks[7], (c_hid,)),
        c_13_w=r(ks[8], (c_hid, c_hid, 1, 3)), c_13_b=r(ks[9], (c_hid,)),
        c_31_w=r(ks[10], (c_hid, c_hid, 3, 1)), c_31_b=r(ks[11], (c_hid,)),
        c_a_end_w=r(ks[12], (c_hid, 2 * c_hid, 1, 1)), c_a_end_b=r(ks[13], (c_hid,)),
        c_b_end_w=r(ks[14], (c_hid, 2 * c_hid, 1, 1)), c_b_end_b=r(ks[15], (c_hid,)),
    )


def pack_fif_block_params(tw):
    """PyTorch FiFBLock convs -> (9, 2Ch, 2Ch) matmul weights + (5, 2Ch, 1) columns.

    Weights: 0  [conv_a; conv_b] 1x1 (rows 0:Ch / Ch:2Ch)
             1..3 (1,3) taps left/center/right = blockdiag(diag(gc_13_k), c_13_k)
             4..6 (3,1) taps up/center/down    = blockdiag(diag(gc_31_k), c_31_k)
             7  end-conv cols for [x11; x21]   = blockdiag(a_end[:, :Ch], b_end[:, :Ch])
             8  end-conv cols for [x12; x22]   = blockdiag(a_end[:, Ch:], b_end[:, Ch:])
    Columns: 0 [a_b; b_b]  1 [gc13_b; c13_b]  2 [gc31_b; c31_b]
             3 per-row clamp cap (3.0 for Hardtanh rows, FLT_MAX for ReLU rows)
             4 [a_end_b; b_end_b]
    """
    Ch = tw["conv_a_w"].shape[0]
    assert tw["conv_a_w"].shape[1] == 2 * Ch, "FiFModule uses hid = in_channels // 2"
    z = jnp.zeros((Ch, Ch), jnp.float32)
    bd = lambda a, b: jnp.block([[a, z], [z, b]])

    d13 = tw["gc_13_w"][:, 0, 0, :]      # (Ch, 3) left/center/right
    d31 = tw["gc_31_w"][:, 0, :, 0]      # (Ch, 3) up/center/down
    c13 = tw["c_13_w"][:, :, 0, :]       # (Ch, Ch, 3)
    c31 = tw["c_31_w"][:, :, :, 0]       # (Ch, Ch, 3)
    ae = tw["c_a_end_w"][:, :, 0, 0]     # (Ch, 2Ch)
    be = tw["c_b_end_w"][:, :, 0, 0]

    W = [jnp.concatenate([tw["conv_a_w"][:, :, 0, 0], tw["conv_b_w"][:, :, 0, 0]], 0)]
    W += [bd(jnp.diag(d13[:, k]), c13[:, :, k]) for k in range(3)]
    W += [bd(jnp.diag(d31[:, k]), c31[:, :, k]) for k in range(3)]
    W += [bd(ae[:, :Ch], be[:, :Ch]), bd(ae[:, Ch:], be[:, Ch:])]
    W = jnp.stack(W)                                              # (9, 2Ch, 2Ch)

    cat = lambda a, b: jnp.concatenate([a, b])
    cap = cat(jnp.full((Ch,), 3.0, jnp.float32),
              jnp.full((Ch,), jnp.finfo(jnp.float32).max, jnp.float32))
    B = jnp.stack([cat(tw["conv_a_b"], tw["conv_b_b"]),
                   cat(tw["gc_13_b"], tw["c_13_b"]),
                   cat(tw["gc_31_b"], tw["c_31_b"]),
                   cap,
                   cat(tw["c_a_end_b"], tw["c_b_end_b"])])[:, :, None]   # (5, 2Ch, 1)
    return W, B


def pack_gc_params(w, b):
    """torch depthwise (C,1,3,3)+(C,) -> (9, C, 1) taps (k = kh*3+kw) and (C, 1) bias."""
    C = w.shape[0]
    taps = jnp.transpose(w.reshape(C, 9), (1, 0))[:, :, None]
    return taps, b.reshape(C, 1)


def pack_fif_module_params(gc_w_t, gc_b_t, fif_a_tw, fif_b_tw):
    gw, gb = pack_gc_params(gc_w_t, gc_b_t)
    wa, ba = pack_fif_block_params(fif_a_tw)
    wb, bb = pack_fif_block_params(fif_b_tw)
    return dict(gc_w=gw, gc_b=gb,
                fif_w=jnp.stack([wa, wb]),      # (2, 9, C, C)
                fif_b=jnp.stack([ba, bb]))      # (2, 5, C, 1)


# ---------------------------------------------------------------------------
if __name__ == "__main__":
    key = jax.random.PRNGKey(0)
    # gc is depthwise (groups == hid_channels) => in_channels must equal hid_channels.
    N, C, H, W = 2, 8, 16, 16
    k_x, k_gw, k_gb, k_a, k_b = jax.random.split(key, 5)

    x = jax.random.normal(k_x, (N, C, H, W), jnp.float32)
    gc_w_t = jax.random.normal(k_gw, (C, 1, 3, 3), jnp.float32) * 0.1
    gc_b_t = jax.random.normal(k_gb, (C,), jnp.float32) * 0.1

    params = pack_fif_module_params(
        gc_w_t, gc_b_t,
        init_fif_block_torch_params(k_a, C, C // 2),
        init_fif_block_torch_params(k_b, C, C // 2),
    )

    out = jax.jit(fif_module_forward)(x, params)
    jax.block_until_ready(out)

    Ho = (H + 2 - 3) // 2 + 1
    Wo = (W + 2 - 3) // 2 + 1
    assert out.shape == (N, C, Ho, Wo), out.shape
    assert bool(jnp.all(jnp.isfinite(out)))
    # TODO(synk): for large H*W, replace the (L,L) shift / (H*W,L) gather matmuls with
    # pltpu.roll + halo-tiled BlockSpecs and tile the lane dimension instead.
    print("KERNEL_OK")
</pallas_src>

<mosaic_0001>
module attributes {stable_mosaic.version = 11 : i64} {
  func.func @_fused_kernel(%arg0: i32, %arg1: memref<2x8x256xf32, #tpu.memory_space<vmem>>, %arg2: memref<2x9x256x128xbf16, #tpu.memory_space<vmem>>, %arg3: memref<9x8x1xf32, #tpu.memory_space<vmem>>, %arg4: memref<8x1xf32, #tpu.memory_space<vmem>>, %arg5: memref<4x128x128xbf16, #tpu.memory_space<vmem>>, %arg6: memref<2x9x8x8xbf16, #tpu.memory_space<vmem>>, %arg7: memref<2x5x8x1xf32, #tpu.memory_space<vmem>>, %arg8: memref<8x128xf32, #tpu.memory_space<vmem>>) attributes {dimension_semantics = [#tpu.dimension_semantics<parallel>], iteration_bounds = array<i64: 1>, scalar_prefetch = 0 : i64, scratch_operands = 0 : i64, tpu.core_type = #tpu.core_type<tc>, window_params = [{transform_indices = @transform_0, window_bounds = array<i64: 2, 8, 256>}, {pipeline_mode = #tpu.pipeline_mode<synchronous>, transform_indices = @transform_1, window_bounds = array<i64: 2, 9, 256, 128>}, {pipeline_mode = #tpu.pipeline_mode<synchronous>, transform_indices = @transform_2, window_bounds = array<i64: 9, 8, 1>}, {pipeline_mode = #tpu.pipeline_mode<synchronous>, transform_indices = @transform_3, window_bounds = array<i64: 8, 1>}, {pipeline_mode = #tpu.pipeline_mode<synchronous>, transform_indices = @transform_4, window_bounds = array<i64: 4, 128, 128>}, {pipeline_mode = #tpu.pipeline_mode<synchronous>, transform_indices = @transform_5, window_bounds = array<i64: 2, 9, 8, 8>}, {pipeline_mode = #tpu.pipeline_mode<synchronous>, transform_indices = @transform_6, window_bounds = array<i64: 2, 5, 8, 1>}, {transform_indices = @transform_7, window_bounds = array<i64: 8, 128>}]} {
    %c0 = arith.constant 0 : index
    %c0_0 = arith.constant 0 : index
    %c0_1 = arith.constant 0 : index
    %0 = vector.load %arg1[%c0, %c0_0, %c0_1] : memref<2x8x256xf32, #tpu.memory_space<vmem>>, vector<1x8x256xf32>
    %1 = vector.shape_cast %0 : vector<1x8x256xf32> to vector<8x256xf32>
    %2 = arith.truncf %1 : vector<8x256xf32> to vector<8x256xbf16>
    %c1 = arith.constant 1 : index
    %c0_2 = arith.constant 0 : index
    %c0_3 = arith.constant 0 : index
    %3 = vector.load %arg1[%c1, %c0_2, %c0_3] : memref<2x8x256xf32, #tpu.memory_space<vmem>>, vector<1x8x256xf32>
    %4 = vector.shape_cast %3 : vector<1x8x256xf32> to vector<8x256xf32>
    %5 = arith.truncf %4 : vector<8x256xf32> to vector<8x256xbf16>
    %cst = arith.constant 0.000000e+00 : f32
    %6 = vector.broadcast %cst : f32 to vector<8x128xf32>
    %c0_4 = arith.constant 0 : index
    %c0_5 = arith.constant 0 : index
    %c0_6 = arith.constant 0 : index
    %c0_7 = arith.constant 0 : index
    %7 = vector.load %arg2[%c0_4, %c0_5, %c0_6, %c0_7] : memref<2x9x256x128xbf16, #tpu.memory_space<vmem>>, vector<1x1x256x128xbf16>
    %8 = vector.shape_cast %7 : vector<1x1x256x128xbf16> to vector<256x128xbf16>
    %cst_8 = arith.constant dense<0.000000e+00> : vector<8x128xf32>
    %9 = tpu.matmul %2, %8, %cst_8 {dimension_numbers = #tpu.dot_dimension_numbers<[1], [0], [0], [1], [0, 0, 1, 1], [], []>} : vector<8x256xbf16>, vector<256x128xbf16>, vector<8x128xf32> -> vector<8x128xf32>
    %c1_9 = arith.constant 1 : index
    %c0_10 = arith.constant 0 : index
    %c0_11 = arith.constant 0 : index
    %c0_12 = arith.constant 0 : index
    %10 = vector.load %arg2[%c1_9, %c0_10, %c0_11, %c0_12] : memref<2x9x256x128xbf16, #tpu.memory_space<vmem>>, vector<1x1x256x128xbf16>
    %11 = vector.shape_cast %10 : vector<1x1x256x128xbf16> to vector<256x128xbf16>
    %cst_13 = arith.constant dense<0.000000e+00> : vector<8x128xf32>
    %12 = tpu.matmul %5, %11, %cst_13 {dimension_numbers = #tpu.dot_dimension_numbers<[1], [0], [0], [1], [0, 0, 1, 1], [], []>} : vector<8x256xbf16>, vector<256x128xbf16>, vector<8x128xf32> -> vector<8x128xf32>
    %13 = arith.addf %9, %12 : vector<8x128xf32>
    %c0_14 = arith.constant 0 : index
    %c0_15 = arith.constant 0 : index
    %c0_16 = arith.constant 0 : index
    %14 = vector.load %arg3[%c0_14, %c0_15, %c0_16] : memref<9x8x1xf32, #tpu.memory_space<vmem>>, vector<1x8x1xf32>
    %15 = vector.shape_cast %14 : vector<1x8x1xf32> to vector<8x1xf32>
    %16 = vector.broadcast %15 : vector<8x1xf32> to vector<8x128xf32>
    %17 = arith.mulf %16, %13 : vector<8x128xf32>
    %18 = arith.addf %6, %17 : vector<8x128xf32>
    %c0_17 = arith.constant 0 : index
    %c1_18 = arith.constant 1 : index
    %c0_19 = arith.constant 0 : index
    %c0_20 = arith.constant 0 : index
    %19 = vector.load %arg2[%c0_17, %c1_18, %c0_19, %c0_20] : memref<2x9x256x128xbf16, #tpu.memory_space<vmem>>, vector<1x1x256x128xbf16>
    %20 = vector.shape_cast %19 : vector<1x1x256x128xbf16> to vector<256x128xbf16>
    %cst_21 = arith.constant dense<0.000000e+00> : vector<8x128xf32>
    %21 = tpu.matmul %2, %20, %cst_21 {dimension_numbers = #tpu.dot_dimension_numbers<[1], [0], [0], [1], [0, 0, 1, 1], [], []>} : vector<8x256xbf16>, vector<256x128xbf16>, vector<8x128xf32> -> vector<8x128xf32>
    %c1_22 = arith.constant 1 : index
    %c1_23 = arith.constant 1 : index
    %c0_24 = arith.constant 0 : index
    %c0_25 = arith.constant 0 : index
    %22 = vector.load %arg2[%c1_22, %c1_23, %c0_24, %c0_25] : memref<2x9x256x128xbf16, #tpu.memory_space<vmem>>, vector<1x1x256x128xbf16>
    %23 = vector.shape_cast %22 : vector<1x1x256x128xbf16> to vector<256x128xbf16>
    %cst_26 = arith.constant dense<0.000000e+00> : vector<8x128xf32>
    %24 = tpu.matmul %5, %23, %cst_26 {dimension_numbers = #tpu.dot_dimension_numbers<[1], [0], [0], [1], [0, 0, 1, 1], [], []>} : vector<8x256xbf16>, vector<256x128xbf16>, vector<8x128xf32> -> vector<8x128xf32>
    %25 = arith.addf %21, %24 : vector<8x128xf32>
    %c1_27 = arith.constant 1 : index
    %c0_28 = arith.constant 0 : index
    %c0_29 = arith.constant 0 : index
    %26 = vector.load %arg3[%c1_27, %c0_28, %c0_29] : memref<9x8x1xf32, #tpu.memory_space<vmem>>, vector<1x8x1xf32>
    %27 = vector.shape_cast %26 : vector<1x8x1xf32> to vector<8x1xf32>
    %28 = vector.broadcast %27 : vector<8x1xf32> to vector<8x128xf32>
    %29 = arith.mulf %28, %25 : vector<8x128xf32>
    %30 = arith.addf %18, %29 : vector<8x128xf32>
    %c0_30 = arith.constant 0 : index
    %c2 = arith.constant 2 : index
    %c0_31 = arith.constant 0 : index
    %c0_32 = arith.constant 0 : index
    %31 = vector.load %arg2[%c0_30, %c2, %c0_31, %c0_32] : memref<2x9x256x128xbf16, #tpu.memory_space<vmem>>, vector<1x1x256x128xbf16>
    %32 = vector.shape_cast %31 : vector<1x1x256x128xbf16> to vector<256x128xbf16>
    %cst_33 = arith.constant dense<0.000000e+00> : vector<8x128xf32>
    %33 = tpu.matmul %2, %32, %cst_33 {dimension_numbers = #tpu.dot_dimension_numbers<[1], [0], [0], [1], [0, 0, 1, 1], [], []>} : vector<8x256xbf16>, vector<256x128xbf16>, vector<8x128xf32> -> vector<8x128xf32>
    %c1_34 = arith.constant 1 : index
    %c2_35 = arith.constant 2 : index
    %c0_36 = arith.constant 0 : index
    %c0_37 = arith.constant 0 : index
    %34 = vector.load %arg2[%c1_34, %c2_35, %c0_36, %c0_37] : memref<2x9x256x128xbf16, #tpu.memory_space<vmem>>, vector<1x1x256x128xbf16>
    %35 = vector.shape_cast %34 : vector<1x1x256x128xbf16> to vector<256x128xbf16>
    %cst_38 = arith.constant dense<0.000000e+00> : vector<8x128xf32>
    %36 = tpu.matmul %5, %35, %cst_38 {dimension_numbers = #tpu.dot_dimension_numbers<[1], [0], [0], [1], [0, 0, 1, 1], [], []>} : vector<8x256xbf16>, vector<256x128xbf16>, vector<8x128xf32> -> vector<8x128xf32>
    %37 = arith.addf %33, %36 : vector<8x128xf32>
    %c2_39 = arith.constant 2 : index
    %c0_40 = arith.constant 0 : index
    %c0_41 = arith.constant 0 : index
    %38 = vector.load %arg3[%c2_39, %c0_40, %c0_41] : memref<9x8x1xf32, #tpu.memory_space<vmem>>, vector<1x8x1xf32>
    %39 = vector.shape_cast %38 : vector<1x8x1xf32> to vector<8x1xf32>
    %40 = vector.broadcast %39 : vector<8x1xf32> to vector<8x128xf32>
    %41 = arith.mulf %40, %37 : vector<8x128xf32>
    %42 = arith.addf %30, %41 : vector<8x128xf32>
    %c0_42 = arith.constant 0 : index
    %c3 = arith.constant 3 : index
    %c0_43 = arith.constant 0 : index
    %c0_44 = arith.constant 0 : index
    %43 = vector.load %arg2[%c0_42, %c3, %c0_43, %c0_44] : memref<2x9x256x128xbf16, #tpu.memory_space<vmem>>, vector<1x1x256x128xbf16>
    %44 = vector.shape_cast %43 : vector<1x1x256x128xbf16> to vector<256x128xbf16>
    %cst_45 = arith.constant dense<0.000000e+00> : vector<8x128xf32>
    %45 = tpu.matmul %2, %44, %cst_45 {dimension_numbers = #tpu.dot_dimension_numbers<[1], [0], [0], [1], [0, 0, 1, 1], [], []>} : vector<8x256xbf16>, vector<256x128xbf16>, vector<8x128xf32> -> vector<8x128xf32>
    %c1_46 = arith.constant 1 : index
    %c3_47 = arith.constant 3 : index
    %c0_48 = arith.constant 0 : index
    %c0_49 = arith.constant 0 : index
    %46 = vector.load %arg2[%c1_46, %c3_47, %c0_48, %c0_49] : memref<2x9x256x128xbf16, #tpu.memory_space<vmem>>, vector<1x1x256x128xbf16>
    %47 = vector.shape_cast %46 : vector<1x1x256x128xbf16> to vector<256x128xbf16>
    %cst_50 = arith.constant dense<0.000000e+00> : vector<8x128xf32>
    %48 = tpu.matmul %5, %47, %cst_50 {dimension_numbers = #tpu.dot_dimension_numbers<[1], [0], [0], [1], [0, 0, 1, 1], [], []>} : vector<8x256xbf16>, vector<256x128xbf16>, vector<8x128xf32> -> vector<8x128xf32>
    %49 = arith.addf %45, %48 : vector<8x128xf32>
    %c3_51 = arith.constant 3 : index
    %c0_52 = arith.constant 0 : index
    %c0_53 = arith.constant 0 : index
    %50 = vector.load %arg3[%c3_51, %c0_52, %c0_53] : memref<9x8x1xf32, #tpu.memory_space<vmem>>, vector<1x8x1xf32>
    %51 = vector.shape_cast %50 : vector<1x8x1xf32> to vector<8x1xf32>
    %52 = vector.broadcast %51 : vector<8x1xf32> to vector<8x128xf32>
    %53 = arith.mulf %52, %49 : vector<8x128xf32>
    %54 = arith.addf %42, %53 : vector<8x128xf32>
    %c0_54 = arith.constant 0 : index
    %c4 = arith.constant 4 : index
    %c0_55 = arith.constant 0 : index
    %c0_56 = arith.constant 0 : index
    %55 = vector.load %arg2[%c0_54, %c4, %c0_55, %c0_56] : memref<2x9x256x128xbf16, #tpu.memory_space<vmem>>, vector<1x1x256x128xbf16>
    %56 = vector.shape_cast %55 : vector<1x1x256x128xbf16> to vector<256x128xbf16>
    %cst_57 = arith.constant dense<0.000000e+00> : vector<8x128xf32>
    %57 = tpu.matmul %2, %56, %cst_57 {dimension_numbers = #tpu.dot_dimension_numbers<[1], [0], [0], [1], [0, 0, 1, 1], [], []>} : vector<8x256xbf16>, vector<256x128xbf16>, vector<8x128xf32> -> vector<8x128xf32>
    %c1_58 = arith.constant 1 : index
    %c4_59 = arith.constant 4 : index
    %c0_60 = arith.constant 0 : index
    %c0_61 = arith.constant 0 : index
    %58 = vector.load %arg2[%c1_58, %c4_59, %c0_60, %c0_61] : memref<2x9x256x128xbf16, #tpu.memory_space<vmem>>, vector<1x1x256x128xbf16>
    %59 = vector.shape_cast %58 : vector<1x1x256x128xbf16> to vector<256x128xbf16>
    %cst_62 = arith.constant dense<0.000000e+00> : vector<8x128xf32>
    %60 = tpu.matmul %5, %59, %cst_62 {dimension_numbers = #tpu.dot_dimension_numbers<[1], [0], [0], [1], [0, 0, 1, 1], [], []>} : vector<8x256xbf16>, vector<256x128xbf16>, vector<8x128xf32> -> vector<8x128xf32>
    %61 = arith.addf %57, %60 : vector<8x128xf32>
    %c4_63 = arith.constant 4 : index
    %c0_64 = arith.constant 0 : index
    %c0_65 = arith.constant 0 : index
    %62 = vector.load %arg3[%c4_63, %c0_64, %c0_65] : memref<9x8x1xf32, #tpu.memory_space<vmem>>, vector<1x8x1xf32>
    %63 = vector.shape_cast %62 : vector<1x8x1xf32> to vector<8x1xf32>
    %64 = vector.broadcast %63 : vector<8x1xf32> to vector<8x128xf32>
    %65 = arith.mulf %64, %61 : vector<8x128xf32>
    %66 = arith.addf %54, %65 : vector<8x128xf32>
    %c0_66 = arith.constant 0 : index
    %c5 = arith.constant 5 : index
    %c0_67 = arith.constant 0 : index
    %c0_68 = arith.constant 0 : index
    %67 = vector.load %arg2[%c0_66, %c5, %c0_67, %c0_68] : memref<2x9x256x128xbf16, #tpu.memory_space<vmem>>, vector<1x1x256x128xbf16>
    %68 = vector.shape_cast %67 : vector<1x1x256x128xbf16> to vector<256x128xbf16>
    %cst_69 = arith.constant dense<0.000000e+00> : vector<8x128xf32>
    %69 = tpu.matmul %2, %68, %cst_69 {dimension_numbers = #tpu.dot_dimension_numbers<[1], [0], [0], [1], [0, 0, 1, 1], [], []>} : vector<8x256xbf16>, vector<256x128xbf16>, vector<8x128xf32> -> vector<8x128xf32>
    %c1_70 = arith.constant 1 : index
    %c5_71 = arith.constant 5 : index
    %c0_72 = arith.constant 0 : index
    %c0_73 = arith.constant 0 : index
    %70 = vector.load %arg2[%c1_70, %c5_71, %c0_72, %c0_73] : memref<2x9x256x128xbf16, #tpu.memory_space<vmem>>, vector<1x1x256x128xbf16>
    %71 = vector.shape_cast %70 : vector<1x1x256x128xbf16> to vector<256x128xbf16>
    %cst_74 = arith.constant dense<0.000000e+00> : vector<8x128xf32>
    %72 = tpu.matmul %5, %71, %cst_74 {dimension_numbers = #tpu.dot_dimension_numbers<[1], [0], [0], [1], [0, 0, 1, 1], [], []>} : vector<8x256xbf16>, vector<256x128xbf16>, vector<8x128xf32> -> vector<8x128xf32>
    %73 = arith.addf %69, %72 : vector<8x128xf32>
    %c5_75 = arith.constant 5 : index
    %c0_76 = arith.constant 0 : index
    %c0_77 = arith.constant 0 : index
    %74 = vector.load %arg3[%c5_75, %c0_76, %c0_77] : memref<9x8x1xf32, #tpu.memory_space<vmem>>, vector<1x8x1xf32>
    %75 = vector.shape_cast %74 : vector<1x8x1xf32> to vector<8x1xf32>
    %76 = vector.broadcast %75 : vector<8x1xf32> to vector<8x128xf32>
    %77 = arith.mulf %76, %73 : vector<8x128xf32>
    %78 = arith.addf %66, %77 : vector<8x128xf32>
    %c0_78 = arith.constant 0 : index
    %c6 = arith.constant 6 : index
    %c0_79 = arith.constant 0 : index
    %c0_80 = arith.constant 0 : index
    %79 = vector.load %arg2[%c0_78, %c6, %c0_79, %c0_80] : memref<2x9x256x128xbf16, #tpu.memory_space<vmem>>, vector<1x1x256x128xbf16>
    %80 = vector.shape_cast %79 : vector<1x1x256x128xbf16> to vector<256x128xbf16>
    %cst_81 = arith.constant dense<0.000000e+00> : vector<8x128xf32>
    %81 = tpu.matmul %2, %80, %cst_81 {dimension_numbers = #tpu.dot_dimension_numbers<[1], [0], [0], [1], [0, 0, 1, 1], [], []>} : vector<8x256xbf16>, vector<256x128xbf16>, vector<8x128xf32> -> vector<8x128xf32>
    %c1_82 = arith.constant 1 : index
    %c6_83 = arith.constant 6 : index
    %c0_84 = arith.constant 0 : index
    %c0_85 = arith.constant 0 : index
    %82 = vector.load %arg2[%c1_82, %c6_83, %c0_84, %c0_85] : memref<2x9x256x128xbf16, #tpu.memory_space<vmem>>, vector<1x1x256x128xbf16>
    %83 = vector.shape_cast %82 : vector<1x1x256x128xbf16> to vector<256x128xbf16>
    %cst_86 = arith.constant dense<0.000000e+00> : vector<8x128xf32>
    %84 = tpu.matmul %5, %83, %cst_86 {dimension_numbers = #tpu.dot_dimension_numbers<[1], [0], [0], [1], [0, 0, 1, 1], [], []>} : vector<8x256xbf16>, vector<256x128xbf16>, vector<8x128xf32> -> vector<8x128xf32>
    %85 = arith.addf %81, %84 : vector<8x128xf32>
    %c6_87 = arith.constant 6 : index
    %c0_88 = arith.constant 0 : index
    %c0_89 = arith.constant 0 : index
    %86 = vector.load %arg3[%c6_87, %c0_88, %c0_89] : memref<9x8x1xf32, #tpu.memory_space<vmem>>, vector<1x8x1xf32>
    %87 = vector.shape_cast %86 : vector<1x8x1xf32> to vector<8x1xf32>
    %88 = vector.broadcast %87 : vector<8x1xf32> to vector<8x128xf32>
    %89 = arith.mulf %88, %85 : vector<8x128xf32>
    %90 = arith.addf %78, %89 : vector<8x128xf32>
    %c0_90 = arith.constant 0 : index
    %c7 = arith.constant 7 : index
    %c0_91 = arith.constant 0 : index
    %c0_92 = arith.constant 0 : index
    %91 = vector.load %arg2[%c0_90, %c7, %c0_91, %c0_92] : memref<2x9x256x128xbf16, #tpu.memory_space<vmem>>, vector<1x1x256x128xbf16>
    %92 = vector.shape_cast %91 : vector<1x1x256x128xbf16> to vector<256x128xbf16>
    %cst_93 = arith.constant dense<0.000000e+00> : vector<8x128xf32>
    %93 = tpu.matmul %2, %92, %cst_93 {dimension_numbers = #tpu.dot_dimension_numbers<[1], [0], [0], [1], [0, 0, 1, 1], [], []>} : vector<8x256xbf16>, vector<256x128xbf16>, vector<8x128xf32> -> vector<8x128xf32>
    %c1_94 = arith.constant 1 : index
    %c7_95 = arith.constant 7 : index
    %c0_96 = arith.constant 0 : index
    %c0_97 = arith.constant 0 : index
    %94 = vector.load %arg2[%c1_94, %c7_95, %c0_96, %c0_97] : memref<2x9x256x128xbf16, #tpu.memory_space<vmem>>, vector<1x1x256x128xbf16>
    %95 = vector.shape_cast %94 : vector<1x1x256x128xbf16> to vector<256x128xbf16>
    %cst_98 = arith.constant dense<0.000000e+00> : vector<8x128xf32>
    %96 = tpu.matmul %5, %95, %cst_98 {dimension_numbers = #tpu.dot_dimension_numbers<[1], [0], [0], [1], [0, 0, 1, 1], [], []>} : vector<8x256xbf16>, vector<256x128xbf16>, vector<8x128xf32> -> vector<8x128xf32>
    %97 = arith.addf %93, %96 : vector<8x128xf32>
    %c7_99 = arith.constant 7 : index
    %c0_100 = arith.constant 0 : index
    %c0_101 = arith.constant 0 : index
    %98 = vector.load %arg3[%c7_99, %c0_100, %c0_101] : memref<9x8x1xf32, #tpu.memory_space<vmem>>, vector<1x8x1xf32>
    %99 = vector.shape_cast %98 : vector<1x8x1xf32> to vector<8x1xf32>
    %100 = vector.broadcast %99 : vector<8x1xf32> to vector<8x128xf32>
    %101 = arith.mulf %100, %97 : vector<8x128xf32>
    %102 = arith.addf %90, %101 : vector<8x128xf32>
    %c0_102 = arith.constant 0 : index
    %c8 = arith.constant 8 : index
    %c0_103 = arith.constant 0 : index
    %c0_104 = arith.constant 0 : index
    %103 = vector.load %arg2[%c0_102, %c8, %c0_103, %c0_104] : memref<2x9x256x128xbf16, #tpu.memory_space<vmem>>, vector<1x1x256x128xbf16>
    %104 = vector.shape_cast %103 : vector<1x1x256x128xbf16> to vector<256x128xbf16>
    %cst_105 = arith.constant dense<0.000000e+00> : vector<8x128xf32>
    %105 = tpu.matmul %2, %104, %cst_105 {dimension_numbers = #tpu.dot_dimension_numbers<[1], [0], [0], [1], [0, 0, 1, 1], [], []>} : vector<8x256xbf16>, vector<256x128xbf16>, vector<8x128xf32> -> vector<8x128xf32>
    %c1_106 = arith.constant 1 : index
    %c8_107 = arith.constant 8 : index
    %c0_108 = arith.constant 0 : index
    %c0_109 = arith.constant 0 : index
    %106 = vector.load %arg2[%c1_106, %c8_107, %c0_108, %c0_109] : memref<2x9x256x128xbf16, #tpu.memory_space<vmem>>, vector<1x1x256x128xbf16>
    %107 = vector.shape_cast %106 : vector<1x1x256x128xbf16> to vector<256x128xbf16>
    %cst_110 = arith.constant dense<0.000000e+00> : vector<8x128xf32>
    %108 = tpu.matmul %5, %107, %cst_110 {dimension_numbers = #tpu.dot_dimension_numbers<[1], [0], [0], [1], [0, 0, 1, 1], [], []>} : vector<8x256xbf16>, vector<256x128xbf16>, vector<8x128xf32> -> vector<8x128xf32>
    %109 = arith.addf %105, %108 : vector<8x128xf32>
    %c8_111 = arith.constant 8 : index
    %c0_112 = arith.constant 0 : index
    %c0_113 = arith.constant 0 : index
    %110 = vector.load %arg3[%c8_111, %c0_112, %c0_113] : memref<9x8x1xf32, #tpu.memory_space<vmem>>, vector<1x8x1xf32>
    %111 = vector.shape_cast %110 : vector<1x8x1xf32> to vector<8x1xf32>
    %112 = vector.broadcast %111 : vector<8x1xf32> to vector<8x128xf32>
    %113 = arith.mulf %112, %109 : vector<8x128xf32>
    %114 = arith.addf %102, %113 : vector<8x128xf32>
    %c0_114 = arith.constant 0 : index
    %c0_115 = arith.constant 0 : index
    %115 = vector.load %arg4[%c0_114, %c0_115] : memref<8x1xf32, #tpu.memory_space<vmem>>, vector<8x1xf32>
    %116 = vector.broadcast %115 : vector<8x1xf32> to vector<8x128xf32>
    %117 = arith.addf %114, %116 : vector<8x128xf32>
    %cst_116 = arith.constant 0.000000e+00 : f32
    %cst_117 = arith.constant 3.000000e+00 : f32
    %118 = vector.broadcast %cst_116 : f32 to vector<8x128xf32>
    %119 = arith.maximumf %118, %117 : vector<8x128xf32>
    %120 = vector.broadcast %cst_117 : f32 to vector<8x128xf32>
    %121 = arith.minimumf %120, %119 : vector<8x128xf32>
    %c0_118 = arith.constant 0 : index
    %c0_119 = arith.constant 0 : index
    %c0_120 = arith.constant 0 : index
    %c0_121 = arith.constant 0 : index
    %122 = vector.load %arg6[%c0_118, %c0_119, %c0_120, %c0_121] : memref<2x9x8x8xbf16, #tpu.memory_space<vmem>>, vector<1x1x8x8xbf16>
    %123 = vector.shape_cast %122 : vector<1x1x8x8xbf16> to vector<8x8xbf16>
    %124 = arith.truncf %121 : vector<8x128xf32> to vector<8x128xbf16>
    %cst_122 = arith.constant dense<0.000000e+00> : vector<8x128xf32>
    %125 = tpu.matmul %123, %124, %cst_122 {dimension_numbers = #tpu.dot_dimension_numbers<[1], [0], [0], [1], [0, 0, 1, 1], [], []>} : vector<8x8xbf16>, vector<8x128xbf16>, vector<8x128xf32> -> vector<8x128xf32>
    %c0_123 = arith.constant 0 : index
    %c0_124 = arith.constant 0 : index
    %c0_125 = arith.constant 0 : index
    %c0_126 = arith.constant 0 : index
    %126 = vector.load %arg7[%c0_123, %c0_124, %c0_125, %c0_126] : memref<2x5x8x1xf32, #tpu.memory_space<vmem>>, vector<1x1x8x1xf32>
    %127 = vector.shape_cast %126 : vector<1x1x8x1xf32> to vector<8x1xf32>
    %128 = vector.broadcast %127 : vector<8x1xf32> to vector<8x128xf32>
    %129 = arith.addf %125, %128 : vector<8x128xf32>
    %cst_127 = arith.constant 0.000000e+00 : f32
    %130 = vector.broadcast %cst_127 : f32 to vector<8x128xf32>
    %131 = arith.maximumf %129, %130 : vector<8x128xf32>
    %132 = arith.truncf %131 : vector<8x128xf32> to vector<8x128xbf16>
    %c0_128 = arith.constant 0 : index
    %c0_129 = arith.constant 0 : index
    %c0_130 = arith.constant 0 : index
    %133 = vector.load %arg5[%c0_128, %c0_129, %c0_130] : memref<4x128x128xbf16, #tpu.memory_space<vmem>>, vector<1x128x128xbf16>
    %134 = vector.shape_cast %133 : vector<1x128x128xbf16> to vector<128x128xbf16>
    %cst_131 = arith.constant dense<0.000000e+00> : vector<8x128xf32>
    %135 = tpu.matmul %132, %134, %cst_131 {dimension_numbers = #tpu.dot_dimension_numbers<[1], [0], [0], [1], [0, 0, 1, 1], [], []>} : vector<8x128xbf16>, vector<128x128xbf16>, vector<8x128xf32> -> vector<8x128xf32>
    %136 = arith.truncf %135 : vector<8x128xf32> to vector<8x128xbf16>
    %c1_132 = arith.constant 1 : index
    %c0_133 = arith.constant 0 : index
    %c0_134 = arith.constant 0 : index
    %137 = vector.load %arg5[%c1_132, %c0_133, %c0_134] : memref<4x128x128xbf16, #tpu.memory_space<vmem>>, vector<1x128x128xbf16>
    %138 = vector.shape_cast %137 : vector<1x128x128xbf16> to vector<128x128xbf16>
    %cst_135 = arith.constant dense<0.000000e+00> : vector<8x128xf32>
    %139 = tpu.matmul %132, %138, %cst_135 {dimension_numbers = #tpu.dot_dimension_numbers<[1], [0], [0], [1], [0, 0, 1, 1], [], []>} : vector<8x128xbf16>, vector<128x128xbf16>, vector<8x128xf32> -> vector<8x128xf32>
    %140 = arith.truncf %139 : vector<8x128xf32> to vector<8x128xbf16>
    %c2_136 = arith.constant 2 : index
    %c0_137 = arith.constant 0 : index
    %c0_138 = arith.constant 0 : index
    %141 = vector.load %arg5[%c2_136, %c0_137, %c0_138] : memref<4x128x128xbf16, #tpu.memory_space<vmem>>, vector<1x128x128xbf16>
    %142 = vector.shape_cast %141 : vector<1x128x128xbf16> to vector<128x128xbf16>
    %cst_139 = arith.constant dense<0.000000e+00> : vector<8x128xf32>
    %143 = tpu.matmul %132, %142, %cst_139 {dimension_numbers = #tpu.dot_dimension_numbers<[1], [0], [0], [1], [0, 0, 1, 1], [], []>} : vector<8x128xbf16>, vector<128x128xbf16>, vector<8x128xf32> -> vector<8x128xf32>
    %144 = arith.truncf %143 : vector<8x128xf32> to vector<8x128xbf16>
    %c3_140 = arith.constant 3 : index
    %c0_141 = arith.constant 0 : index
    %c0_142 = arith.constant 0 : index
    %145 = vector.load %arg5[%c3_140, %c0_141, %c0_142] : memref<4x128x128xbf16, #tpu.memory_space<vmem>>, vector<1x128x128xbf16>
    %146 = vector.shape_cast %145 : vector<1x128x128xbf16> to vector<128x128xbf16>
    %cst_143 = arith.constant dense<0.000000e+00> : vector<8x128xf32>
    %147 = tpu.matmul %132, %146, %cst_143 {dimension_numbers = #tpu.dot_dimension_numbers<[1], [0], [0], [1], [0, 0, 1, 1], [], []>} : vector<8x128xbf16>, vector<128x128xbf16>, vector<8x128xf32> -> vector<8x128xf32>
    %148 = arith.truncf %147 : vector<8x128xf32> to vector<8x128xbf16>
    %c0_144 = arith.constant 0 : index
    %c1_145 = arith.constant 1 : index
    %c0_146 = arith.constant 0 : index
    %c0_147 = arith.constant 0 : index
    %149 = vector.load %arg6[%c0_144, %c1_145, %c0_146, %c0_147] : memref<2x9x8x8xbf16, #tpu.memory_space<vmem>>, vector<1x1x8x8xbf16>
    %150 = vector.shape_cast %149 : vector<1x1x8x8xbf16> to vector<8x8xbf16>
    %cst_148 = arith.constant dense<0.000000e+00> : vector<8x128xf32>
    %151 = tpu.matmul %150, %136, %cst_148 {dimension_numbers = #tpu.dot_dimension_numbers<[1], [0], [0], [1], [0, 0, 1, 1], [], []>} : vector<8x8xbf16>, vector<8x128xbf16>, vector<8x128xf32> -> vector<8x128xf32>
    %c0_149 = arith.constant 0 : index
    %c2_150 = arith.constant 2 : index
    %c0_151 = arith.constant 0 : index
    %c0_152 = arith.constant 0 : index
    %152 = vector.load %arg6[%c0_149, %c2_150, %c0_151, %c0_152] : memref<2x9x8x8xbf16, #tpu.memory_space<vmem>>, vector<1x1x8x8xbf16>
    %153 = vector.shape_cast %152 : vector<1x1x8x8xbf16> to vector<8x8xbf16>
    %cst_153 = arith.constant dense<0.000000e+00> : vector<8x128xf32>
    %154 = tpu.matmul %153, %132, %cst_153 {dimension_numbers = #tpu.dot_dimension_numbers<[1], [0], [0], [1], [0, 0, 1, 1], [], []>} : vector<8x8xbf16>, vector<8x128xbf16>, vector<8x128xf32> -> vector<8x128xf32>
    %155 = arith.addf %151, %154 : vector<8x128xf32>
    %c0_154 = arith.constant 0 : index
    %c3_155 = arith.constant 3 : index
    %c0_156 = arith.constant 0 : index
    %c0_157 = arith.constant 0 : index
    %156 = vector.load %arg6[%c0_154, %c3_155, %c0_156, %c0_157] : memref<2x9x8x8xbf16, #tpu.memory_space<vmem>>, vector<1x1x8x8xbf16>
    %157 = vector.shape_cast %156 : vector<1x1x8x8xbf16> to vector<8x8xbf16>
    %cst_158 = arith.constant dense<0.000000e+00> : vector<8x128xf32>
    %158 = tpu.matmul %157, %140, %cst_158 {dimension_numbers = #tpu.dot_dimension_numbers<[1], [0], [0], [1], [0, 0, 1, 1], [], []>} : vector<8x8xbf16>, vector<8x128xbf16>, vector<8x128xf32> -> vector<8x128xf32>
    %159 = arith.addf %155, %158 : vector<8x128xf32>
    %c0_159 = arith.constant 0 : index
    %c1_160 = arith.constant 1 : index
    %c0_161 = arith.constant 0 : index
    %c0_162 = arith.constant 0 : index
    %160 = vector.load %arg7[%c0_159, %c1_160, %c0_161, %c0_162] : memref<2x5x8x1xf32, #tpu.memory_space<vmem>>, vector<1x1x8x1xf32>
    %161 = vector.shape_cast %160 : vector<1x1x8x1xf32> to vector<8x1xf32>
    %162 = vector.broadcast %161 : vector<8x1xf32> to vector<8x128xf32>
    %163 = arith.addf %159, %162 : vector<8x128xf32>
    %c0_163 = arith.constant 0 : index
    %c4_164 = arith.constant 4 : index
    %c0_165 = arith.constant 0 : index
    %c0_166 = arith.constant 0 : index
    %164 = vector.load %arg6[%c0_163, %c4_164, %c0_165, %c0_166] : memref<2x9x8x8xbf16, #tpu.memory_space<vmem>>, vector<1x1x8x8xbf16>
    %165 = vector.shape_cast %164 : vector<1x1x8x8xbf16> to vector<8x8xbf16>
    %cst_167 = arith.constant dense<0.000000e+00> : vector<8x128xf32>
    %166 = tpu.matmul %165, %144, %cst_167 {dimension_numbers = #tpu.dot_dimension_numbers<[1], [0], [0], [1], [0, 0, 1, 1], [], []>} : vector<8x8xbf16>, vector<8x128xbf16>, vector<8x128xf32> -> vector<8x128xf32>
    %c0_168 = arith.constant 0 : index
    %c5_169 = arith.constant 5 : index
    %c0_170 = arith.constant 0 : index
    %c0_171 = arith.constant 0 : index
    %167 = vector.load %arg6[%c0_168, %c5_169, %c0_170, %c0_171] : memref<2x9x8x8xbf16, #tpu.memory_space<vmem>>, vector<1x1x8x8xbf16>
    %168 = vector.shape_cast %167 : vector<1x1x8x8xbf16> to vector<8x8xbf16>
    %cst_172 = arith.constant dense<0.000000e+00> : vector<8x128xf32>
    %169 = tpu.matmul %168, %132, %cst_172 {dimension_numbers = #tpu.dot_dimension_numbers<[1], [0], [0], [1], [0, 0, 1, 1], [], []>} : vector<8x8xbf16>, vector<8x128xbf16>, vector<8x128xf32> -> vector<8x128xf32>
    %170 = arith.addf %166, %169 : vector<8x128xf32>
    %c0_173 = arith.constant 0 : index
    %c6_174 = arith.constant 6 : index
    %c0_175 = arith.constant 0 : index
    %c0_176 = arith.constant 0 : index
    %171 = vector.load %arg6[%c0_173, %c6_174, %c0_175, %c0_176] : memref<2x9x8x8xbf16, #tpu.memory_space<vmem>>, vector<1x1x8x8xbf16>
    %172 = vector.shape_cast %171 : vector<1x1x8x8xbf16> to vector<8x8xbf16>
    %cst_177 = arith.constant dense<0.000000e+00> : vector<8x128xf32>
    %173 = tpu.matmul %172, %148, %cst_177 {dimension_numbers = #tpu.dot_dimension_numbers<[1], [0], [0], [1], [0, 0, 1, 1], [], []>} : vector<8x8xbf16>, vector<8x128xbf16>, vector<8x128xf32> -> vector<8x128xf32>
    %174 = arith.addf %170, %173 : vector<8x128xf32>
    %c0_178 = arith.constant 0 : index
    %c2_179 = arith.constant 2 : index
    %c0_180 = arith.constant 0 : index
    %c0_181 = arith.constant 0 : index
    %175 = vector.load %arg7[%c0_178, %c2_179, %c0_180, %c0_181] : memref<2x5x8x1xf32, #tpu.memory_space<vmem>>, vector<1x1x8x1xf32>
    %176 = vector.shape_cast %175 : vector<1x1x8x1xf32> to vector<8x1xf32>
    %177 = vector.broadcast %176 : vector<8x1xf32> to vector<8x128xf32>
    %178 = arith.addf %174, %177 : vector<8x128xf32>
    %c0_182 = arith.constant 0 : index
    %c3_183 = arith.constant 3 : index
    %c0_184 = arith.constant 0 : index
    %c0_185 = arith.constant 0 : index
    %179 = vector.load %arg7[%c0_182, %c3_183, %c0_184, %c0_185] : memref<2x5x8x1xf32, #tpu.memory_space<vmem>>, vector<1x1x8x1xf32>
    %180 = vector.shape_cast %179 : vector<1x1x8x1xf32> to vector<8x1xf32>
    %cst_186 = arith.constant 0.000000e+00 : f32
    %181 = vector.broadcast %cst_186 : f32 to vector<8x128xf32>
    %182 = arith.maximumf %163, %181 : vector<8x128xf32>
    %183 = vector.broadcast %180 : vector<8x1xf32> to vector<8x128xf32>
    %184 = arith.minimumf %182, %183 : vector<8x128xf32>
    %cst_187 = arith.constant 0.000000e+00 : f32
    %185 = vector.broadcast %cst_187 : f32 to vector<8x128xf32>
    %186 = arith.maximumf %178, %185 : vector<8x128xf32>
    %187 = vector.broadcast %180 : vector<8x1xf32> to vector<8x128xf32>
    %188 = arith.minimumf %186, %187 : vector<8x128xf32>
    %c0_188 = arith.constant 0 : index
    %c7_189 = arith.constant 7 : index
    %c0_190 = arith.constant 0 : index
    %c0_191 = arith.constant 0 : index
    %189 = vector.load %arg6[%c0_188, %c7_189, %c0_190, %c0_191] : memref<2x9x8x8xbf16, #tpu.memory_space<vmem>>, vector<1x1x8x8xbf16>
    %190 = vector.shape_cast %189 : vector<1x1x8x8xbf16> to vector<8x8xbf16>
    %191 = arith.truncf %184 : vector<8x128xf32> to vector<8x128xbf16>
    %cst_192 = arith.constant dense<0.000000e+00> : vector<8x128xf32>
    %192 = tpu.matmul %190, %191, %cst_192 {dimension_numbers = #tpu.dot_dimension_numbers<[1], [0], [0], [1], [0, 0, 1, 1], [], []>} : vector<8x8xbf16>, vector<8x128xbf16>, vector<8x128xf32> -> vector<8x128xf32>
    %c0_193 = arith.constant 0 : index
    %c8_194 = arith.constant 8 : index
    %c0_195 = arith.constant 0 : index
    %c0_196 = arith.constant 0 : index
    %193 = vector.load %arg6[%c0_193, %c8_194, %c0_195, %c0_196] : memref<2x9x8x8xbf16, #tpu.memory_space<vmem>>, vector<1x1x8x8xbf16>
    %194 = vector.shape_cast %193 : vector<1x1x8x8xbf16> to vector<8x8xbf16>
    %195 = arith.truncf %188 : vector<8x128xf32> to vector<8x128xbf16>
    %cst_197 = arith.constant dense<0.000000e+00> : vector<8x128xf32>
    %196 = tpu.matmul %194, %195, %cst_197 {dimension_numbers = #tpu.dot_dimension_numbers<[1], [0], [0], [1], [0, 0, 1, 1], [], []>} : vector<8x8xbf16>, vector<8x128xbf16>, vector<8x128xf32> -> vector<8x128xf32>
    %197 = arith.addf %192, %196 : vector<8x128xf32>
    %c0_198 = arith.constant 0 : index
    %c4_199 = arith.constant 4 : index
    %c0_200 = arith.constant 0 : index
    %c0_201 = arith.constant 0 : index
    %198 = vector.load %arg7[%c0_198, %c4_199, %c0_200, %c0_201] : memref<2x5x8x1xf32, #tpu.memory_space<vmem>>, vector<1x1x8x1xf32>
    %199 = vector.shape_cast %198 : vector<1x1x8x1xf32> to vector<8x1xf32>
    %200 = vector.broadcast %199 : vector<8x1xf32> to vector<8x128xf32>
    %201 = arith.addf %197, %200 : vector<8x128xf32>
    %cst_202 = arith.constant 0.000000e+00 : f32
    %202 = vector.broadcast %cst_202 : f32 to vector<8x128xf32>
    %203 = arith.maximumf %201, %202 : vector<8x128xf32>
    %204 = arith.addf %203, %121 : vector<8x128xf32>
    %c1_203 = arith.constant 1 : index
    %c0_204 = arith.constant 0 : index
    %c0_205 = arith.constant 0 : index
    %c0_206 = arith.constant 0 : index
    %205 = vector.load %arg6[%c1_203, %c0_204, %c0_205, %c0_206] : memref<2x9x8x8xbf16, #tpu.memory_space<vmem>>, vector<1x1x8x8xbf16>
    %206 = vector.shape_cast %205 : vector<1x1x8x8xbf16> to vector<8x8xbf16>
    %207 = arith.truncf %204 : vector<8x128xf32> to vector<8x128xbf16>
    %cst_207 = arith.constant dense<0.000000e+00> : vector<8x128xf32>
    %208 = tpu.matmul %206, %207, %cst_207 {dimension_numbers = #tpu.dot_dimension_numbers<[1], [0], [0], [1], [0, 0, 1, 1], [], []>} : vector<8x8xbf16>, vector<8x128xbf16>, vector<8x128xf32> -> vector<8x128xf32>
    %c1_208 = arith.constant 1 : index
    %c0_209 = arith.constant 0 : index
    %c0_210 = arith.constant 0 : index
    %c0_211 = arith.constant 0 : index
    %209 = vector.load %arg7[%c1_208, %c0_209, %c0_210, %c0_211] : memref<2x5x8x1xf32, #tpu.memory_space<vmem>>, vector<1x1x8x1xf32>
    %210 = vector.shape_cast %209 : vector<1x1x8x1xf32> to vector<8x1xf32>
    %211 = vector.broadcast %210 : vector<8x1xf32> to vector<8x128xf32>
    %212 = arith.addf %208, %211 : vector<8x128xf32>
    %cst_212 = arith.constant 0.000000e+00 : f32
    %213 = vector.broadcast %cst_212 : f32 to vector<8x128xf32>
    %214 = arith.maximumf %212, %213 : vector<8x128xf32>
    %215 = arith.truncf %214 : vector<8x128xf32> to vector<8x128xbf16>
    %c0_213 = arith.constant 0 : index
    %c0_214 = arith.constant 0 : index
    %c0_215 = arith.constant 0 : index
    %216 = vector.load %arg5[%c0_213, %c0_214, %c0_215] : memref<4x128x128xbf16, #tpu.memory_space<vmem>>, vector<1x128x128xbf16>
    %217 = vector.shape_cast %216 : vector<1x128x128xbf16> to vector<128x128xbf16>
    %cst_216 = arith.constant dense<0.000000e+00> : vector<8x128xf32>
    %218 = tpu.matmul %215, %217, %cst_216 {dimension_numbers = #tpu.dot_dimension_numbers<[1], [0], [0], [1], [0, 0, 1, 1], [], []>} : vector<8x128xbf16>, vector<128x128xbf16>, vector<8x128xf32> -> vector<8x128xf32>
    %219 = arith.truncf %218 : vector<8x128xf32> to vector<8x128xbf16>
    %c1_217 = arith.constant 1 : index
    %c0_218 = arith.constant 0 : index
    %c0_219 = arith.constant 0 : index
    %220 = vector.load %arg5[%c1_217, %c0_218, %c0_219] : memref<4x128x128xbf16, #tpu.memory_space<vmem>>, vector<1x128x128xbf16>
    %221 = vector.shape_cast %220 : vector<1x128x128xbf16> to vector<128x128xbf16>
    %cst_220 = arith.constant dense<0.000000e+00> : vector<8x128xf32>
    %222 = tpu.matmul %215, %221, %cst_220 {dimension_numbers = #tpu.dot_dimension_numbers<[1], [0], [0], [1], [0, 0, 1, 1], [], []>} : vector<8x128xbf16>, vector<128x128xbf16>, vector<8x128xf32> -> vector<8x128xf32>
    %223 = arith.truncf %222 : vector<8x128xf32> to vector<8x128xbf16>
    %c2_221 = arith.constant 2 : index
    %c0_222 = arith.constant 0 : index
    %c0_223 = arith.constant 0 : index
    %224 = vector.load %arg5[%c2_221, %c0_222, %c0_223] : memref<4x128x128xbf16, #tpu.memory_space<vmem>>, vector<1x128x128xbf16>
    %225 = vector.shape_cast %224 : vector<1x128x128xbf16> to vector<128x128xbf16>
    %cst_224 = arith.constant dense<0.000000e+00> : vector<8x128xf32>
    %226 = tpu.matmul %215, %225, %cst_224 {dimension_numbers = #tpu.dot_dimension_numbers<[1], [0], [0], [1], [0, 0, 1, 1], [], []>} : vector<8x128xbf16>, vector<128x128xbf16>, vector<8x128xf32> -> vector<8x128xf32>
    %227 = arith.truncf %226 : vector<8x128xf32> to vector<8x128xbf16>
    %c3_225 = arith.constant 3 : index
    %c0_226 = arith.constant 0 : index
    %c0_227 = arith.constant 0 : index
    %228 = vector.load %arg5[%c3_225, %c0_226, %c0_227] : memref<4x128x128xbf16, #tpu.memory_space<vmem>>, vector<1x128x128xbf16>
    %229 = vector.shape_cast %228 : vector<1x128x128xbf16> to vector<128x128xbf16>
    %cst_228 = arith.constant dense<0.000000e+00> : vector<8x128xf32>
    %230 = tpu.matmul %215, %229, %cst_228 {dimension_numbers = #tpu.dot_dimension_numbers<[1], [0], [0], [1], [0, 0, 1, 1], [], []>} : vector<8x128xbf16>, vector<128x128xbf16>, vector<8x128xf32> -> vector<8x128xf32>
    %231 = arith.truncf %230 : vector<8x128xf32> to vector<8x128xbf16>
    %c1_229 = arith.constant 1 : index
    %c1_230 = arith.constant 1 : index
    %c0_231 = arith.constant 0 : index
    %c0_232 = arith.constant 0 : index
    %232 = vector.load %arg6[%c1_229, %c1_230, %c0_231, %c0_232] : memref<2x9x8x8xbf16, #tpu.memory_space<vmem>>, vector<1x1x8x8xbf16>
    %233 = vector.shape_cast %232 : vector<1x1x8x8xbf16> to vector<8x8xbf16>
    %cst_233 = arith.constant dense<0.000000e+00> : vector<8x128xf32>
    %234 = tpu.matmul %233, %219, %cst_233 {dimension_numbers = #tpu.dot_dimension_numbers<[1], [0], [0], [1], [0, 0, 1, 1], [], []>} : vector<8x8xbf16>, vector<8x128xbf16>, vector<8x128xf32> -> vector<8x128xf32>
    %c1_234 = arith.constant 1 : index
    %c2_235 = arith.constant 2 : index
    %c0_236 = arith.constant 0 : index
    %c0_237 = arith.constant 0 : index
    %235 = vector.load %arg6[%c1_234, %c2_235, %c0_236, %c0_237] : memref<2x9x8x8xbf16, #tpu.memory_space<vmem>>, vector<1x1x8x8xbf16>
    %236 = vector.shape_cast %235 : vector<1x1x8x8xbf16> to vector<8x8xbf16>
    %cst_238 = arith.constant dense<0.000000e+00> : vector<8x128xf32>
    %237 = tpu.matmul %236, %215, %cst_238 {dimension_numbers = #tpu.dot_dimension_numbers<[1], [0], [0], [1], [0, 0, 1, 1], [], []>} : vector<8x8xbf16>, vector<8x128xbf16>, vector<8x128xf32> -> vector<8x128xf32>
    %238 = arith.addf %234, %237 : vector<8x128xf32>
    %c1_239 = arith.constant 1 : index
    %c3_240 = arith.constant 3 : index
    %c0_241 = arith.constant 0 : index
    %c0_242 = arith.constant 0 : index
    %239 = vector.load %arg6[%c1_239, %c3_240, %c0_241, %c0_242] : memref<2x9x8x8xbf16, #tpu.memory_space<vmem>>, vector<1x1x8x8xbf16>
    %240 = vector.shape_cast %239 : vector<1x1x8x8xbf16> to vector<8x8xbf16>
    %cst_243 = arith.constant dense<0.000000e+00> : vector<8x128xf32>
    %241 = tpu.matmul %240, %223, %cst_243 {dimension_numbers = #tpu.dot_dimension_numbers<[1], [0], [0], [1], [0, 0, 1, 1], [], []>} : vector<8x8xbf16>, vector<8x128xbf16>, vector<8x128xf32> -> vector<8x128xf32>
    %242 = arith.addf %238, %241 : vector<8x128xf32>
    %c1_244 = arith.constant 1 : index
    %c1_245 = arith.constant 1 : index
    %c0_246 = arith.constant 0 : index
    %c0_247 = arith.constant 0 : index
    %243 = vector.load %arg7[%c1_244, %c1_245, %c0_246, %c0_247] : memref<2x5x8x1xf32, #tpu.memory_space<vmem>>, vector<1x1x8x1xf32>
    %244 = vector.shape_cast %243 : vector<1x1x8x1xf32> to vector<8x1xf32>
    %245 = vector.broadcast %244 : vector<8x1xf32> to vector<8x128xf32>
    %246 = arith.addf %242, %245 : vector<8x128xf32>
    %c1_248 = arith.constant 1 : index
    %c4_249 = arith.constant 4 : index
    %c0_250 = arith.constant 0 : index
    %c0_251 = arith.constant 0 : index
    %247 = vector.load %arg6[%c1_248, %c4_249, %c0_250, %c0_251] : memref<2x9x8x8xbf16, #tpu.memory_space<vmem>>, vector<1x1x8x8xbf16>
    %248 = vector.shape_cast %247 : vector<1x1x8x8xbf16> to vector<8x8xbf16>
    %cst_252 = arith.constant dense<0.000000e+00> : vector<8x128xf32>
    %249 = tpu.matmul %248, %227, %cst_252 {dimension_numbers = #tpu.dot_dimension_numbers<[1], [0], [0], [1], [0, 0, 1, 1], [], []>} : vector<8x8xbf16>, vector<8x128xbf16>, vector<8x128xf32> -> vector<8x128xf32>
    %c1_253 = arith.constant 1 : index
    %c5_254 = arith.constant 5 : index
    %c0_255 = arith.constant 0 : index
    %c0_256 = arith.constant 0 : index
    %250 = vector.load %arg6[%c1_253, %c5_254, %c0_255, %c0_256] : memref<2x9x8x8xbf16, #tpu.memory_space<vmem>>, vector<1x1x8x8xbf16>
    %251 = vector.shape_cast %250 : vector<1x1x8x8xbf16> to vector<8x8xbf16>
    %cst_257 = arith.constant dense<0.000000e+00> : vector<8x128xf32>
    %252 = tpu.matmul %251, %215, %cst_257 {dimension_numbers = #tpu.dot_dimension_numbers<[1], [0], [0], [1], [0, 0, 1, 1], [], []>} : vector<8x8xbf16>, vector<8x128xbf16>, vector<8x128xf32> -> vector<8x128xf32>
    %253 = arith.addf %249, %252 : vector<8x128xf32>
    %c1_258 = arith.constant 1 : index
    %c6_259 = arith.constant 6 : index
    %c0_260 = arith.constant 0 : index
    %c0_261 = arith.constant 0 : index
    %254 = vector.load %arg6[%c1_258, %c6_259, %c0_260, %c0_261] : memref<2x9x8x8xbf16, #tpu.memory_space<vmem>>, vector<1x1x8x8xbf16>
    %255 = vector.shape_cast %254 : vector<1x1x8x8xbf16> to vector<8x8xbf16>
    %cst_262 = arith.constant dense<0.000000e+00> : vector<8x128xf32>
    %256 = tpu.matmul %255, %231, %cst_262 {dimension_numbers = #tpu.dot_dimension_numbers<[1], [0], [0], [1], [0, 0, 1, 1], [], []>} : vector<8x8xbf16>, vector<8x128xbf16>, vector<8x128xf32> -> vector<8x128xf32>
    %257 = arith.addf %253, %256 : vector<8x128xf32>
    %c1_263 = arith.constant 1 : index
    %c2_264 = arith.constant 2 : index
    %c0_265 = arith.constant 0 : index
    %c0_266 = arith.constant 0 : index
    %258 = vector.load %arg7[%c1_263, %c2_264, %c0_265, %c0_266] : memref<2x5x8x1xf32, #tpu.memory_space<vmem>>, vector<1x1x8x1xf32>
    %259 = vector.shape_cast %258 : vector<1x1x8x1xf32> to vector<8x1xf32>
    %260 = vector.broadcast %259 : vector<8x1xf32> to vector<8x128xf32>
    %261 = arith.addf %257, %260 : vector<8x128xf32>
    %c1_267 = arith.constant 1 : index
    %c3_268 = arith.constant 3 : index
    %c0_269 = arith.constant 0 : index
    %c0_270 = arith.constant 0 : index
    %262 = vector.load %arg7[%c1_267, %c3_268, %c0_269, %c0_270] : memref<2x5x8x1xf32, #tpu.memory_space<vmem>>, vector<1x1x8x1xf32>
    %263 = vector.shape_cast %262 : vector<1x1x8x1xf32> to vector<8x1xf32>
    %cst_271 = arith.constant 0.000000e+00 : f32
    %264 = vector.broadcast %cst_271 : f32 to vector<8x128xf32>
    %265 = arith.maximumf %246, %264 : vector<8x128xf32>
    %266 = vector.broadcast %263 : vector<8x1xf32> to vector<8x128xf32>
    %267 = arith.minimumf %265, %266 : vector<8x128xf32>
    %cst_272 = arith.constant 0.000000e+00 : f32
    %268 = vector.broadcast %cst_272 : f32 to vector<8x128xf32>
    %269 = arith.maximumf %261, %268 : vector<8x128xf32>
    %270 = vector.broadcast %263 : vector<8x1xf32> to vector<8x128xf32>
    %271 = arith.minimumf %269, %270 : vector<8x128xf32>
    %c1_273 = arith.constant 1 : index
    %c7_274 = arith.constant 7 : index
    %c0_275 = arith.constant 0 : index
    %c0_276 = arith.constant 0 : index
    %272 = vector.load %arg6[%c1_273, %c7_274, %c0_275, %c0_276] : memref<2x9x8x8xbf16, #tpu.memory_space<vmem>>, vector<1x1x8x8xbf16>
    %273 = vector.shape_cast %272 : vector<1x1x8x8xbf16> to vector<8x8xbf16>
    %274 = arith.truncf %267 : vector<8x128xf32> to vector<8x128xbf16>
    %cst_277 = arith.constant dense<0.000000e+00> : vector<8x128xf32>
    %275 = tpu.matmul %273, %274, %cst_277 {dimension_numbers = #tpu.dot_dimension_numbers<[1], [0], [0], [1], [0, 0, 1, 1], [], []>} : vector<8x8xbf16>, vector<8x128xbf16>, vector<8x128xf32> -> vector<8x128xf32>
    %c1_278 = arith.constant 1 : index
    %c8_279 = arith.constant 8 : index
    %c0_280 = arith.constant 0 : index
    %c0_281 = arith.constant 0 : index
    %276 = vector.load %arg6[%c1_278, %c8_279, %c0_280, %c0_281] : memref<2x9x8x8xbf16, #tpu.memory_space<vmem>>, vector<1x1x8x8xbf16>
    %277 = vector.shape_cast %276 : vector<1x1x8x8xbf16> to vector<8x8xbf16>
    %278 = arith.truncf %271 : vector<8x128xf32> to vector<8x128xbf16>
    %cst_282 = arith.constant dense<0.000000e+00> : vector<8x128xf32>
    %279 = tpu.matmul %277, %278, %cst_282 {dimension_numbers = #tpu.dot_dimension_numbers<[1], [0], [0], [1], [0, 0, 1, 1], [], []>} : vector<8x8xbf16>, vector<8x128xbf16>, vector<8x128xf32> -> vector<8x128xf32>
    %280 = arith.addf %275, %279 : vector<8x128xf32>
    %c1_283 = arith.constant 1 : index
    %c4_284 = arith.constant 4 : index
    %c0_285 = arith.constant 0 : index
    %c0_286 = arith.constant 0 : index
    %281 = vector.load %arg7[%c1_283, %c4_284, %c0_285, %c0_286] : memref<2x5x8x1xf32, #tpu.memory_space<vmem>>, vector<1x1x8x1xf32>
    %282 = vector.shape_cast %281 : vector<1x1x8x1xf32> to vector<8x1xf32>
    %283 = vector.broadcast %282 : vector<8x1xf32> to vector<8x128xf32>
    %284 = arith.addf %280, %283 : vector<8x128xf32>
    %cst_287 = arith.constant 0.000000e+00 : f32
    %285 = vector.broadcast %cst_287 : f32 to vector<8x128xf32>
    %286 = arith.maximumf %284, %285 : vector<8x128xf32>
    %c0_288 = arith.constant 0 : index
    %c0_289 = arith.constant 0 : index
    %287 = vector.load %arg8[%c0_288, %c0_289] : memref<8x128xf32, #tpu.memory_space<vmem>>, vector<8x128xf32>
    tpu.vector_store %arg8[%c0_288, %c0_289], %286 {strides = array<i32>} : memref<8x128xf32, #tpu.memory_space<vmem>>, vector<8x128xf32>,
    return
  }
  func.func @transform_0(%arg0: i32) -> (i32, i32, i32) {
    %c0_i32 = arith.constant 0 : i32
    %c0_i32_0 = arith.constant 0 : i32
    %c0_i32_1 = arith.constant 0 : i32
    return %arg0, %c0_i32, %c0_i32_0 : i32, i32, i32
  }
  func.func @transform_1(%arg0: i32) -> (i32, i32, i32, i32) {
    %c0_i32 = arith.constant 0 : i32
    %c0_i32_0 = arith.constant 0 : i32
    %c0_i32_1 = arith.constant 0 : i32
    %c0_i32_2 = arith.constant 0 : i32
    %c0_i32_3 = arith.constant 0 : i32
    return %c0_i32, %c0_i32_0, %c0_i32_1, %c0_i32_2 : i32, i32, i32, i32
  }
  func.func @transform_2(%arg0: i32) -> (i32, i32, i32) {
    %c0_i32 = arith.constant 0 : i32
    %c0_i32_0 = arith.constant 0 : i32
    %c0_i32_1 = arith.constant 0 : i32
    %c0_i32_2 = arith.constant 0 : i32
    return %c0_i32, %c0_i32_0, %c0_i32_1 : i32, i32, i32
  }
  func.func @transform_3(%arg0: i32) -> (i32, i32) {
    %c0_i32 = arith.constant 0 : i32
    %c0_i32_0 = arith.constant 0 : i32
    %c0_i32_1 = arith.constant 0 : i32
    return %c0_i32, %c0_i32_0 : i32, i32
  }
  func.func @transform_4(%arg0: i32) -> (i32, i32, i32) {
    %c0_i32 = arith.constant 0 : i32
    %c0_i32_0 = arith.constant 0 : i32
    %c0_i32_1 = arith.constant 0 : i32
    %c0_i32_2 = arith.constant 0 : i32
    return %c0_i32, %c0_i32_0, %c0_i32_1 : i32, i32, i32
  }
  func.func @transform_5(%arg0: i32) -> (i32, i32, i32, i32) {
    %c0_i32 = arith.constant 0 : i32
    %c0_i32_0 = arith.constant 0 : i32
    %c0_i32_1 = arith.constant 0 : i32
    %c0_i32_2 = arith.constant 0 : i32
    %c0_i32_3 = arith.constant 0 : i32
    return %c0_i32, %c0_i32_0, %c0_i32_1, %c0_i32_2 : i32, i32, i32, i32
  }
  func.func @transform_6(%arg0: i32) -> (i32, i32, i32, i32) {
    %c0_i32 = arith.constant 0 : i32
    %c0_i32_0 = arith.constant 0 : i32
    %c0_i32_1 = arith.constant 0 : i32
    %c0_i32_2 = arith.constant 0 : i32
    %c0_i32_3 = arith.constant 0 : i32
    return %c0_i32, %c0_i32_0, %c0_i32_1, %c0_i32_2 : i32, i32, i32, i32
  }
  func.func @transform_7(%arg0: i32) -> (i32, i32) {
    %c0_i32 = arith.constant 0 : i32
    %c0_i32_0 = arith.constant 0 : i32
    return %c0_i32, %arg0 : i32, i32
  }
}

</mosaic_0001>

<bundles_post_ra>
// kernel: fif_module_forward.1
= control target key start
LH: loop header
LB: loop body
LE: loop exit
PB: predicated region body
PF: predicated region fallthrough
CT: control target
= control target key end

     0   :  { %12 = vsyncpa [#allocation3], 0  ;;  %s5907_s0 = inlined_call_operand.vmem [shape: f32[2,8,256], index: 0, kind: input, shape index: {}]   ;;  %s5908_s1 = inlined_call_operand.hbm [shape: bf16[2,9,256,128], index: 1, kind: input, shape index: {}]   ;;  %s5909_s2 = inlined_call_operand.vmem [shape: f32[9,8,1], index: 2, kind: input, shape index: {}]   ;;  %s5910_s3 = inlined_call_operand.vmem [shape: f32[8,1], index: 3, kind: input, shape index: {}]   ;;  %s5911_s4 = inlined_call_operand.hbm [shape: bf16[4,128,128], index: 4, kind: input, shape index: {}]   ;;  %s5912_s5 = inlined_call_operand.vmem [shape: bf16[2,9,8,8], index: 5, kind: input, shape index: {}]   ;;  %s5913_s6 = inlined_call_operand.vmem [shape: f32[2,5,8,1], index: 6, kind: input, shape index: {}]   ;;  %s5914_s7 = inlined_call_operand.vmem [shape: f32[8,128], index: 7, kind: output, shape index: {}]  }
   0x1   :  { %s20_s26 = sshll.u32 %s5908_s1, 4  ;;  %s21_s26 = int_to_ptr.hbm [resolvable:$true] %s20_s26 }
   0x2   :  { %13 = vsyncpa [#allocation5], 0  ;;  %s5511_s27 = smov [#allocation2]   ;;  %s37_s8 = sshll.u32 %s5911_s4, 4  ;;  %s38_s8 = int_to_ptr.hbm [resolvable:$true] %s37_s8 }
   0x3   :  { %s22_s28 = sshll.u32 %s5511_s27, 4  ;;  %s5512_s9 = smov 64   ;;  %s23_s28 = int_to_ptr.vmem [resolvable:$true] %s22_s28 }
   0x4   :  { %s5513_s10 = smov 4   ;;  %s5514_s11 = smov [#allocation4]  }
   0x5   :  { %28 = dma.hbm_to_vmem [thread:$0]  %s21_s26, 36864, %s23_s28, [#allocation3], %s5512_s9, %s5512_s9, %s5513_s10  }
   0x6   :  { %s39_s12 = sshll.u32 %s5514_s11, 4  ;;  %s40_s12 = int_to_ptr.vmem [resolvable:$true] %s39_s12 }
   0x7   :  { %45 = dma.hbm_to_vmem [thread:$0]  %s38_s8, 4096, %s40_s12, [#allocation5], %s5512_s9, %s5512_s9, %s5513_s10  }
   0x8   :  { %5507 = dma.done.wait [#allocation3], 36864  }
   0x9   :  { %5508 = vsyncadd [#allocation3], 4294930432 }
   0xa   :  { %5509 = dma.done.wait [#allocation5], 4096  }
   0xb   :  { %5510 = vsyncadd [#allocation5], 4294963200  ;;  %v5154_v0 = vld [vmem:[#allocation2 + $0x4b8] sm:$0xff]  ;;  %v5153_v4 = vld [vmem:[#allocation2 + $0x4b0] sm:$0xff]  ;;  %v5515_v61 = vmov 0   ;;  %vm2958_vm0 = vcmask 1043456  }
   0xc   :  { %v5162_v1 = vld [vmem:[#allocation2 + $0x4f8] sm:$0xff]  ;;  %229 = vmatpush.bf16.msra.mxu0 %v5154_v0  ;;  %v5161_v5 = vld [vmem:[#allocation2 + $0x4f0] sm:$0xff]  ;;  %v5152_v8 = vld [vmem:[#allocation2 + $0x4a8] sm:$0xff]  ;;  %5456 = vset.pattern.permute.xlu0 %v5515_v61  ;;  %vm2954_vm1 = vcmask 64512  }
   0xd   :  { %v5138_v2 = vld [vmem:[#allocation2 + $0x38] sm:$0xff]  ;;  %242 = vmatpush.bf16.msra.mxu1 %v5162_v1  ;;  %v5137_v6 = vld [vmem:[#allocation2 + $0x30] sm:$0xff]  ;;  %v5160_v9 = vld [vmem:[#allocation2 + $0x4e8] sm:$0xff]  ;;  %5457 = vset.pattern.permute.xlu1 %v5515_v61 }
   0xe   :  { %v5146_v3 = vld [vmem:[#allocation2 + $0x78] sm:$0xff]  ;;  %351 = vmatpush.bf16.msra.mxu2 %v5138_v2  ;;  %v5145_v7 = vld [vmem:[#allocation2 + $0x70] sm:$0xff]  ;;  %v5136_v10 = vld [vmem:[#allocation2 + $0x28] sm:$0xff]  ;;  %5458 = vset.pattern.permute.xlu2 %v5515_v61 }
   0xf   :  { %364 = vmatpush.bf16.msra.mxu3 %v5146_v3  ;;  %v5144_v11 = vld [vmem:[#allocation2 + $0x68] sm:$0xff]  ;;  %v5151_v12 = vld [vmem:[#allocation2 + $0x4a0] sm:$0xff]  ;;  %v5150_v16 = vld [vmem:[#allocation2 + $0x498] sm:$0xff] }
  0x10   :  { %230 = vmatpush.bf16.msra.mxu0 %v5153_v4  ;;  %v5159_v13 = vld [vmem:[#allocation2 + $0x4e0] sm:$0xff]  ;;  %v5158_v17 = vld [vmem:[#allocation2 + $0x4d8] sm:$0xff]  ;;  %v5149_v20 = vld [vmem:[#allocation2 + $0x490] sm:$0xff] }
  0x11   :  { %243 = vmatpush.bf16.msra.mxu1 %v5161_v5  ;;  %v5135_v14 = vld [vmem:[#allocation2 + $0x20] sm:$0xff]  ;;  %v5134_v18 = vld [vmem:[#allocation2 + $0x18] sm:$0xff]  ;;  %v5157_v21 = vld [vmem:[#allocation2 + $0x4d0] sm:$0xff] }
  0x12   :  { %352 = vmatpush.bf16.msra.mxu2 %v5137_v6  ;;  %v5143_v15 = vld [vmem:[#allocation2 + $0x60] sm:$0xff]  ;;  %v5142_v19 = vld [vmem:[#allocation2 + $0x58] sm:$0xff]  ;;  %v5133_v22 = vld [vmem:[#allocation2 + $0x10] sm:$0xff] }
  0x13   :  { %365 = vmatpush.bf16.msra.mxu3 %v5145_v7  ;;  %v5141_v23 = vld [vmem:[#allocation2 + $0x50] sm:$0xff]  ;;  %v5148_v24 = vld [vmem:[#allocation2 + $0x488] sm:$0xff]  ;;  %v5147_v28 = vld [vmem:[#allocation2 + $0x480] sm:$0xff] }
  0x14   :  { %231 = vmatpush.bf16.msra.mxu0 %v5152_v8  ;;  %v5156_v25 = vld [vmem:[#allocation2 + $0x4c8] sm:$0xff]  ;;  %v5155_v29 = vld [vmem:[#allocation2 + $0x4c0] sm:$0xff]  ;;  %v5186_v32 = vld [vmem:[#allocation2 + $0x538] sm:$0xff] }
  0x15   :  { %244 = vmatpush.bf16.msra.mxu1 %v5160_v9  ;;  %v5132_v26 = vld [vmem:[#allocation2 + $0x8] sm:$0xff]  ;;  %v5131_v30 = vld [vmem:[#allocation2] sm:$0xff]  ;;  %v5194_v35 = vld [vmem:[#allocation2 + $0x578] sm:$0xff] }
  0x16   :  { %353 = vmatpush.bf16.msra.mxu2 %v5136_v10  ;;  %v5140_v27 = vld [vmem:[#allocation2 + $0x48] sm:$0xff]  ;;  %v5139_v31 = vld [vmem:[#allocation2 + $0x40] sm:$0xff]  ;;  %v3797_v36 = vld [vmem:[%s5907_s0 + $0x10] sm:$0xff] }
  0x17   :  { %366 = vmatpush.bf16.msra.mxu3 %v5144_v11  ;;  %v59_v33 = vld [vmem:[%s5907_s0] sm:$0xff]  ;;  %v60_v34 = vld [vmem:[%s5907_s0 + $0x8] sm:$0xff]  ;;  %v3798_v37 = vld [vmem:[%s5907_s0 + $0x18] sm:$0xff]  ;;  %v5578_v42 = vpack.c.bf16 %v3797_v36, %v3797_v36 }
  0x18   :  { %232 = vmatpush.bf16.msra.mxu0 %v5151_v12  ;;  %v5170_v38 = vld [vmem:[#allocation2 + $0xb8] sm:$0xff]  ;;  %v5574_v40 = vpack.c.bf16 %v59_v33, %v59_v33  ;;  %v5576_v41 = vpack.c.bf16 %v60_v34, %v60_v34  ;;  %v5580_v43 = vpack.c.bf16 %v3798_v37, %v3798_v37  ;;  %v5185_v44 = vld [vmem:[#allocation2 + $0x530] sm:$0xff]  ;;  %v5184_v48 = vld [vmem:[#allocation2 + $0x528] sm:$0xff] }
  0x19   :  { %245 = vmatpush.bf16.msra.mxu1 %v5159_v13  ;;  %v5178_v39 = vld [vmem:[#allocation2 + $0xf8] sm:$0xff]  ;;  %v5193_v45 = vld [vmem:[#allocation2 + $0x570] sm:$0xff]  ;;  %v5192_v49 = vld [vmem:[#allocation2 + $0x568] sm:$0xff] }
  0x1a   :  { %354 = vmatpush.bf16.msra.mxu2 %v5135_v14  ;;  %v5169_v46 = vld [vmem:[#allocation2 + $0xb0] sm:$0xff]  ;;  %v5168_v50 = vld [vmem:[#allocation2 + $0xa8] sm:$0xff]  ;;  %v5183_v52 = vld [vmem:[#allocation2 + $0x520] sm:$0xff] }
  0x1b   :  { %367 = vmatpush.bf16.msra.mxu3 %v5143_v15  ;;  %v5177_v47 = vld [vmem:[#allocation2 + $0xf0] sm:$0xff]  ;;  %v5176_v51 = vld [vmem:[#allocation2 + $0xe8] sm:$0xff]  ;;  %v5191_v53 = vld [vmem:[#allocation2 + $0x560] sm:$0xff] }
  0x1c   :  { %233 = vmatpush.bf16.msra.mxu0 %v5150_v16  ;;  %v5167_v54 = vld [vmem:[#allocation2 + $0xa0] sm:$0xff]  ;;  %v5182_v56 = vld [vmem:[#allocation2 + $0x518] sm:$0xff]  ;;  %v5181_v62 = vld [vmem:[#allocation2 + $0x510] sm:$0xff] }
  0x1d   :  { %246 = vmatpush.bf16.msra.mxu1 %v5158_v17  ;;  %v5175_v55 = vld [vmem:[#allocation2 + $0xe0] sm:$0xff]  ;;  %v5190_v57 = vld [vmem:[#allocation2 + $0x558] sm:$0xff]  ;;  %v5189_v63 = vld [vmem:[#allocation2 + $0x550] sm:$0xff] }
  0x1e   :  { %355 = vmatpush.bf16.msra.mxu2 %v5134_v18  ;;  %v377_v58 = vld [vmem:[%s5909_s2] sm:$0xff]  ;;  %v5166_v59 = vld [vmem:[#allocation2 + $0x98] sm:$0xff]  ;;  %v5165_v0 = vld [vmem:[#allocation2 + $0x90] sm:$0xff] }
  0x1f   :  { %368 = vmatpush.bf16.msra.mxu3 %v5142_v19  ;;  %v5174_v60 = vld [vmem:[#allocation2 + $0xd8] sm:$0xff]  ;;  %380 = vperm.xlu0 %5456, %v377_v58   ;;  %v5173_v1 = vld [vmem:[#allocation2 + $0xd0] sm:$0xff]  ;;  %v5180_v2 = vld [vmem:[#allocation2 + $0x508] sm:$0xff] }
  0x20   :  { %234 = vmatpush.bf16.msra.mxu0 %v5149_v20  ;;  %v5188_v3 = vld [vmem:[#allocation2 + $0x548] sm:$0xff]  ;;  %v5179_v7 = vld [vmem:[#allocation2 + $0x500] sm:$0xff]  ;;  %v5218_v11 = vld [vmem:[#allocation2 + $0x5b8] sm:$0xff] }
  0x21   :  { %247 = vmatpush.bf16.msra.mxu1 %v5157_v21  ;;  %v4055_v4 = vld [vmem:[%s5909_s2 + $0x8] sm:$0xff]  ;;  %v5187_v8 = vld [vmem:[#allocation2 + $0x540] sm:$0xff]  ;;  %v5226_v12 = vld [vmem:[#allocation2 + $0x5f8] sm:$0xff] }
  0x22   :  { %356 = vmatpush.bf16.msra.mxu2 %v5133_v22  ;;  %v5164_v5 = vld [vmem:[#allocation2 + $0x88] sm:$0xff]  ;;  %v5163_v9 = vld [vmem:[#allocation2 + $0x80] sm:$0xff]  ;;  %v5202_v13 = vld [vmem:[#allocation2 + $0x138] sm:$0xff] }
  0x23   :  { %369 = vmatpush.bf16.msra.mxu3 %v5141_v23  ;;  %v5172_v6 = vld [vmem:[#allocation2 + $0xc8] sm:$0xff]  ;;  %v5171_v10 = vld [vmem:[#allocation2 + $0xc0] sm:$0xff]  ;;  %v5210_v14 = vld [vmem:[#allocation2 + $0x178] sm:$0xff] }
  0x24   :  { %235 = vmatpush.bf16.msra.mxu0 %v5148_v24  ;;  %v5217_v15 = vld [vmem:[#allocation2 + $0x5b0] sm:$0xff]  ;;  %v5216_v19 = vld [vmem:[#allocation2 + $0x5a8] sm:$0xff]  ;;  %v5215_v23 = vld [vmem:[#allocation2 + $0x5a0] sm:$0xff] }
  0x25   :  { %248 = vmatpush.bf16.msra.mxu1 %v5156_v25  ;;  %v5225_v16 = vld [vmem:[#allocation2 + $0x5f0] sm:$0xff]  ;;  %v5224_v20 = vld [vmem:[#allocation2 + $0x5e8] sm:$0xff]  ;;  %v5223_v24 = vld [vmem:[#allocation2 + $0x5e0] sm:$0xff] }
  0x26   :  { %357 = vmatpush.bf16.msra.mxu2 %v5132_v26  ;;  %v5201_v17 = vld [vmem:[#allocation2 + $0x130] sm:$0xff]  ;;  %v5200_v21 = vld [vmem:[#allocation2 + $0x128] sm:$0xff]  ;;  %v5199_v25 = vld [vmem:[#allocation2 + $0x120] sm:$0xff] }
  0x27   :  { %370 = vmatpush.bf16.msra.mxu3 %v5140_v27  ;;  %699 = vperm.xlu0 %5456, %v4055_v4   ;;  %v5209_v18 = vld [vmem:[#allocation2 + $0x170] sm:$0xff]  ;;  %v5208_v22 = vld [vmem:[#allocation2 + $0x168] sm:$0xff]  ;;  %v5207_v26 = vld [vmem:[#allocation2 + $0x160] sm:$0xff] }
  0x28   :  { %236 = vmatpush.bf16.msra.mxu0 %v5147_v28  ;;  %v5214_v27 = vld [vmem:[#allocation2 + $0x598] sm:$0xff]  ;;  %v5197_v33 = vld [vmem:[#allocation2 + $0x110] sm:$0xff]  ;;  %v5212_v36 = vld [vmem:[#allocation2 + $0x588] sm:$0xff] }
  0x29   :  { %249 = vmatpush.bf16.msra.mxu1 %v5155_v29  ;;  %v5222_v28 = vld [vmem:[#allocation2 + $0x5d8] sm:$0xff]  ;;  %v5205_v34 = vld [vmem:[#allocation2 + $0x150] sm:$0xff]  ;;  %v5220_v37 = vld [vmem:[#allocation2 + $0x5c8] sm:$0xff] }
  0x2a   :  { %358 = vmatpush.bf16.msra.mxu2 %v5131_v30  ;;  %v5198_v29 = vld [vmem:[#allocation2 + $0x118] sm:$0xff]  ;;  %v5232_v58 = vld [vmem:[#allocation2 + $0x1a8] sm:$0xff]  ;;  %v5255_v61 = vld [vmem:[#allocation2 + $0x660] sm:$0xff] }
  0x2b   :  { %371 = vmatpush.bf16.msra.mxu3 %v5139_v31  ;;  %237 = vmatmul.bf16.vlgmr.msra.gmra.mxu0 %v5578_v42  ;;  %v5206_v30 = vld [vmem:[#allocation2 + $0x158] sm:$0xff]  ;;  %v5213_v31 = vld [vmem:[#allocation2 + $0x590] sm:$0xff] }
  0x2c   :  { %547 = vmatpush.bf16.msrb.mxu0 %v5186_v32  ;;  %250 = vmatmul.bf16.vlgmr.msra.gmra.mxu1 %v5580_v43  ;;  %v5221_v32 = vld [vmem:[#allocation2 + $0x5d0] sm:$0xff] }
  0x2d   :  { %560 = vmatpush.bf16.msrb.mxu1 %v5194_v35  ;;  %359 = vmatmul.bf16.vlgmr.msra.gmra.mxu2 %v5574_v40  ;;  %v4184_v35 = vld [vmem:[%s5909_s2 + $0x10] sm:$0xff] }
  0x2e   :  { %669 = vmatpush.bf16.msrb.mxu2 %v5170_v38  ;;  %372 = vmatmul.bf16.vlgmr.msra.gmra.mxu3 %v5576_v41  ;;  %v5196_v38 = vld [vmem:[#allocation2 + $0x108] sm:$0xff]  ;;  %v5245_v4 = vld [vmem:[#allocation2 + $0x610] sm:$0xff] }
  0x2f   :  { %682 = vmatpush.bf16.msrb.mxu3 %v5178_v39  ;;  %v5204_v39 = vld [vmem:[#allocation2 + $0x148] sm:$0xff]  ;;  %1018 = vperm.xlu1 %5457, %v4184_v35   ;;  %v5262_v35 = vld [vmem:[#allocation2 + $0x218] sm:$0xff] }
  0x30   :  { %548 = vmatpush.bf16.msrb.mxu0 %v5185_v44  ;;  %v5211_v44 = vld [vmem:[#allocation2 + $0x580] sm:$0xff] }
  0x31   :  { %561 = vmatpush.bf16.msrb.mxu1 %v5193_v45  ;;  %v5219_v45 = vld [vmem:[#allocation2 + $0x5c0] sm:$0xff] }
  0x32   :  { %670 = vmatpush.bf16.msrb.mxu2 %v5169_v46  ;;  %v5195_v46 = vld [vmem:[#allocation2 + $0x100] sm:$0xff] }
  0x33   :  { %683 = vmatpush.bf16.msrb.mxu3 %v5177_v47  ;;  %v5203_v47 = vld [vmem:[#allocation2 + $0x140] sm:$0xff] }
  0x34   :  { %549 = vmatpush.bf16.msrb.mxu0 %v5184_v48  ;;  %v5250_v48 = vld [vmem:[#allocation2 + $0x638] sm:$0xff] }
  0x35   :  { %562 = vmatpush.bf16.msrb.mxu1 %v5192_v49  ;;  %v5258_v49 = vld [vmem:[#allocation2 + $0x678] sm:$0xff] }
  0x36   :  { %671 = vmatpush.bf16.msrb.mxu2 %v5168_v50  ;;  %v5234_v50 = vld [vmem:[#allocation2 + $0x1b8] sm:$0xff] }
  0x37   :  { %684 = vmatpush.bf16.msrb.mxu3 %v5176_v51  ;;  %v5242_v51 = vld [vmem:[#allocation2 + $0x1f8] sm:$0xff] }
  0x38   :  { %550 = vmatpush.bf16.msrb.mxu0 %v5183_v52  ;;  %v5249_v52 = vld [vmem:[#allocation2 + $0x630] sm:$0xff] }
  0x39   :  { %563 = vmatpush.bf16.msrb.mxu1 %v5191_v53  ;;  %v5257_v53 = vld [vmem:[#allocation2 + $0x670] sm:$0xff] }
  0x3a   :  { %672 = vmatpush.bf16.msrb.mxu2 %v5167_v54  ;;  %v5233_v54 = vld [vmem:[#allocation2 + $0x1b0] sm:$0xff] }
  0x3b   :  { %685 = vmatpush.bf16.msrb.mxu3 %v5175_v55  ;;  %v5241_v55 = vld [vmem:[#allocation2 + $0x1f0] sm:$0xff] }
  0x3c   :  { %551 = vmatpush.bf16.msrb.mxu0 %v5182_v56  ;;  %v5248_v56 = vld [vmem:[#allocation2 + $0x628] sm:$0xff] }
  0x3d   :  { %564 = vmatpush.bf16.msrb.mxu1 %v5190_v57  ;;  %v5256_v57 = vld [vmem:[#allocation2 + $0x668] sm:$0xff] }
  0x3e   :  { %673 = vmatpush.bf16.msrb.mxu2 %v5166_v59  ;;  %v5240_v59 = vld [vmem:[#allocation2 + $0x1e8] sm:$0xff] }
  0x3f   :  { %686 = vmatpush.bf16.msrb.mxu3 %v5174_v60  ;;  %v5247_v60 = vld [vmem:[#allocation2 + $0x620] sm:$0xff] }
  0x40   :  { %552 = vmatpush.bf16.msrb.mxu0 %v5181_v62  ;;  %v5231_v62 = vld [vmem:[#allocation2 + $0x1a0] sm:$0xff] }
  0x41   :  { %565 = vmatpush.bf16.msrb.mxu1 %v5189_v63  ;;  %v5239_v63 = vld [vmem:[#allocation2 + $0x1e0] sm:$0xff] }
  0x42   :  { %674 = vmatpush.bf16.msrb.mxu2 %v5165_v0  ;;  %v5246_v0 = vld [vmem:[#allocation2 + $0x618] sm:$0xff] }
  0x43   :  { %687 = vmatpush.bf16.msrb.mxu3 %v5173_v1  ;;  %v5254_v1 = vld [vmem:[#allocation2 + $0x658] sm:$0xff] }
  0x44   :  { %553 = vmatpush.bf16.msrb.mxu0 %v5180_v2  ;;  %v5230_v2 = vld [vmem:[#allocation2 + $0x198] sm:$0xff] }
  0x45   :  { %566 = vmatpush.bf16.msrb.mxu1 %v5188_v3  ;;  %v5238_v3 = vld [vmem:[#allocation2 + $0x1d8] sm:$0xff] }
  0x46   :  { %675 = vmatpush.bf16.msrb.mxu2 %v5164_v5  ;;  %v5253_v5 = vld [vmem:[#allocation2 + $0x650] sm:$0xff] }
  0x47   :  { %688 = vmatpush.bf16.msrb.mxu3 %v5172_v6  ;;  %v5229_v6 = vld [vmem:[#allocation2 + $0x190] sm:$0xff] }
  0x48   :  { %554 = vmatpush.bf16.msrb.mxu0 %v5179_v7  ;;  %v5237_v7 = vld [vmem:[#allocation2 + $0x1d0] sm:$0xff] }
  0x49   :  { %567 = vmatpush.bf16.msrb.mxu1 %v5187_v8  ;;  %v4313_v8 = vld [vmem:[%s5909_s2 + $0x18] sm:$0xff] }
  0x4a   :  { %676 = vmatpush.bf16.msrb.mxu2 %v5163_v9  ;;  %v5244_v9 = vld [vmem:[#allocation2 + $0x608] sm:$0xff]  ;;  %1337 = vperm.xlu1 %5457, %v4313_v8   ;;  %v5310_v8 = vld [vmem:[#allocation2 + $0x718] sm:$0xff] }
  0x4b   :  { %689 = vmatpush.bf16.msrb.mxu3 %v5171_v10  ;;  %555 = vmatmul.bf16.vlgmr.msrb.gmra.mxu0 %v5578_v42  ;;  %v5252_v10 = vld [vmem:[#allocation2 + $0x648] sm:$0xff] }
  0x4c   :  { %866 = vmatpush.bf16.msra.mxu0 %v5218_v11  ;;  %568 = vmatmul.bf16.vlgmr.msrb.gmra.mxu1 %v5580_v43  ;;  %v5228_v11 = vld [vmem:[#allocation2 + $0x188] sm:$0xff] }
  0x4d   :  { %879 = vmatpush.bf16.msra.mxu1 %v5226_v12  ;;  %677 = vmatmul.bf16.vlgmr.msrb.gmra.mxu2 %v5574_v40  ;;  %v5236_v12 = vld [vmem:[#allocation2 + $0x1c8] sm:$0xff] }
  0x4e   :  { %988 = vmatpush.bf16.msra.mxu2 %v5202_v13  ;;  %690 = vmatmul.bf16.vlgmr.msrb.gmra.mxu3 %v5576_v41  ;;  %v5243_v13 = vld [vmem:[#allocation2 + $0x600] sm:$0xff] }
  0x4f   :  { %1001 = vmatpush.bf16.msra.mxu3 %v5210_v14  ;;  %v5251_v14 = vld [vmem:[#allocation2 + $0x640] sm:$0xff] }
  0x50   :  { %867 = vmatpush.bf16.msra.mxu0 %v5217_v15  ;;  %v5227_v15 = vld [vmem:[#allocation2 + $0x180] sm:$0xff] }
  0x51   :  { %880 = vmatpush.bf16.msra.mxu1 %v5225_v16  ;;  %v5235_v16 = vld [vmem:[#allocation2 + $0x1c0] sm:$0xff] }
  0x52   :  { %989 = vmatpush.bf16.msra.mxu2 %v5201_v17  ;;  %v5282_v17 = vld [vmem:[#allocation2 + $0x6b8] sm:$0xff] }
  0x53   :  { %1002 = vmatpush.bf16.msra.mxu3 %v5209_v18  ;;  %v5290_v18 = vld [vmem:[#allocation2 + $0x6f8] sm:$0xff] }
  0x54   :  { %868 = vmatpush.bf16.msra.mxu0 %v5216_v19  ;;  %v5266_v19 = vld [vmem:[#allocation2 + $0x238] sm:$0xff] }
  0x55   :  { %881 = vmatpush.bf16.msra.mxu1 %v5224_v20  ;;  %v5274_v20 = vld [vmem:[#allocation2 + $0x278] sm:$0xff] }
  0x56   :  { %990 = vmatpush.bf16.msra.mxu2 %v5200_v21  ;;  %v5281_v21 = vld [vmem:[#allocation2 + $0x6b0] sm:$0xff] }
  0x57   :  { %1003 = vmatpush.bf16.msra.mxu3 %v5208_v22  ;;  %v5289_v22 = vld [vmem:[#allocation2 + $0x6f0] sm:$0xff] }
  0x58   :  { %869 = vmatpush.bf16.msra.mxu0 %v5215_v23  ;;  %v5265_v23 = vld [vmem:[#allocation2 + $0x230] sm:$0xff] }
  0x59   :  { %882 = vmatpush.bf16.msra.mxu1 %v5223_v24  ;;  %v5273_v24 = vld [vmem:[#allocation2 + $0x270] sm:$0xff] }
  0x5a   :  { %991 = vmatpush.bf16.msra.mxu2 %v5199_v25  ;;  %v5280_v25 = vld [vmem:[#allocation2 + $0x6a8] sm:$0xff] }
  0x5b   :  { %1004 = vmatpush.bf16.msra.mxu3 %v5207_v26  ;;  %v5288_v26 = vld [vmem:[#allocation2 + $0x6e8] sm:$0xff] }
  0x5c   :  { %870 = vmatpush.bf16.msra.mxu0 %v5214_v27  ;;  %v5264_v27 = vld [vmem:[#allocation2 + $0x228] sm:$0xff] }
  0x5d   :  { %883 = vmatpush.bf16.msra.mxu1 %v5222_v28  ;;  %v5272_v28 = vld [vmem:[#allocation2 + $0x268] sm:$0xff] }
  0x5e   :  { %992 = vmatpush.bf16.msra.mxu2 %v5198_v29  ;;  %v5279_v29 = vld [vmem:[#allocation2 + $0x6a0] sm:$0xff] }
  0x5f   :  { %1005 = vmatpush.bf16.msra.mxu3 %v5206_v30  ;;  %v5287_v30 = vld [vmem:[#allocation2 + $0x6e0] sm:$0xff] }
  0x60   :  { %871 = vmatpush.bf16.msra.mxu0 %v5213_v31  ;;  %v5263_v31 = vld [vmem:[#allocation2 + $0x220] sm:$0xff] }
  0x61   :  { %884 = vmatpush.bf16.msra.mxu1 %v5221_v32  ;;  %v5271_v32 = vld [vmem:[#allocation2 + $0x260] sm:$0xff] }
  0x62   :  { %993 = vmatpush.bf16.msra.mxu2 %v5197_v33  ;;  %v5278_v33 = vld [vmem:[#allocation2 + $0x698] sm:$0xff] }
  0x63   :  { %1006 = vmatpush.bf16.msra.mxu3 %v5205_v34  ;;  %v5286_v34 = vld [vmem:[#allocation2 + $0x6d8] sm:$0xff] }
  0x64   :  { %872 = vmatpush.bf16.msra.mxu0 %v5212_v36  ;;  %v5270_v36 = vld [vmem:[#allocation2 + $0x258] sm:$0xff] }
  0x65   :  { %885 = vmatpush.bf16.msra.mxu1 %v5220_v37  ;;  %v5277_v37 = vld [vmem:[#allocation2 + $0x690] sm:$0xff] }
  0x66   :  { %994 = vmatpush.bf16.msra.mxu2 %v5196_v38  ;;  %v5285_v38 = vld [vmem:[#allocation2 + $0x6d0] sm:$0xff] }
  0x67   :  { %1007 = vmatpush.bf16.msra.mxu3 %v5204_v39  ;;  %v5261_v39 = vld [vmem:[#allocation2 + $0x210] sm:$0xff] }
  0x68   :  { %873 = vmatpush.bf16.msra.mxu0 %v5211_v44  ;;  %v5269_v44 = vld [vmem:[#allocation2 + $0x250] sm:$0xff] }
  0x69   :  { %886 = vmatpush.bf16.msra.mxu1 %v5219_v45  ;;  %v5276_v45 = vld [vmem:[#allocation2 + $0x688] sm:$0xff] }
  0x6a   :  { %995 = vmatpush.bf16.msra.mxu2 %v5195_v46  ;;  %v5284_v46 = vld [vmem:[#allocation2 + $0x6c8] sm:$0xff] }
  0x6b   :  { %1008 = vmatpush.bf16.msra.mxu3 %v5203_v47  ;;  %874 = vmatmul.bf16.vlgmr.msra.gmra.mxu0 %v5578_v42  ;;  %v5260_v47 = vld [vmem:[#allocation2 + $0x208] sm:$0xff] }
  0x6c   :  { %1185 = vmatpush.bf16.msrb.mxu0 %v5250_v48  ;;  %887 = vmatmul.bf16.vlgmr.msra.gmra.mxu1 %v5580_v43  ;;  %v5268_v48 = vld [vmem:[#allocation2 + $0x248] sm:$0xff] }
  0x6d   :  { %1198 = vmatpush.bf16.msrb.mxu1 %v5258_v49  ;;  %996 = vmatmul.bf16.vlgmr.msra.gmra.mxu2 %v5574_v40  ;;  %v5275_v49 = vld [vmem:[#allocation2 + $0x680] sm:$0xff] }
  0x6e   :  { %1307 = vmatpush.bf16.msrb.mxu2 %v5234_v50  ;;  %1009 = vmatmul.bf16.vlgmr.msra.gmra.mxu3 %v5576_v41  ;;  %v5283_v50 = vld [vmem:[#allocation2 + $0x6c0] sm:$0xff] }
  0x6f   :  { %1320 = vmatpush.bf16.msrb.mxu3 %v5242_v51  ;;  %v5259_v51 = vld [vmem:[#allocation2 + $0x200] sm:$0xff] }
  0x70   :  { %1186 = vmatpush.bf16.msrb.mxu0 %v5249_v52  ;;  %v5267_v52 = vld [vmem:[#allocation2 + $0x240] sm:$0xff] }
  0x71   :  { %1199 = vmatpush.bf16.msrb.mxu1 %v5257_v53  ;;  %v5314_v53 = vld [vmem:[#allocation2 + $0x738] sm:$0xff] }
  0x72   :  { %1308 = vmatpush.bf16.msrb.mxu2 %v5233_v54  ;;  %v5322_v54 = vld [vmem:[#allocation2 + $0x778] sm:$0xff] }
  0x73   :  { %1321 = vmatpush.bf16.msrb.mxu3 %v5241_v55  ;;  %v5298_v55 = vld [vmem:[#allocation2 + $0x2b8] sm:$0xff] }
  0x74   :  { %1187 = vmatpush.bf16.msrb.mxu0 %v5248_v56  ;;  %v5306_v56 = vld [vmem:[#allocation2 + $0x2f8] sm:$0xff] }
  0x75   :  { %1200 = vmatpush.bf16.msrb.mxu1 %v5256_v57  ;;  %v5313_v57 = vld [vmem:[#allocation2 + $0x730] sm:$0xff] }
  0x76   :  { %1309 = vmatpush.bf16.msrb.mxu2 %v5232_v58  ;;  %v5321_v58 = vld [vmem:[#allocation2 + $0x770] sm:$0xff] }
  0x77   :  { %1322 = vmatpush.bf16.msrb.mxu3 %v5240_v59  ;;  %v5297_v59 = vld [vmem:[#allocation2 + $0x2b0] sm:$0xff] }
  0x78   :  { %1188 = vmatpush.bf16.msrb.mxu0 %v5247_v60  ;;  %v5305_v60 = vld [vmem:[#allocation2 + $0x2f0] sm:$0xff] }
  0x79   :  { %1201 = vmatpush.bf16.msrb.mxu1 %v5255_v61  ;;  %v5312_v61 = vld [vmem:[#allocation2 + $0x728] sm:$0xff] }
  0x7a   :  { %1310 = vmatpush.bf16.msrb.mxu2 %v5231_v62  ;;  %v5320_v62 = vld [vmem:[#allocation2 + $0x768] sm:$0xff] }
  0x7b   :  { %1323 = vmatpush.bf16.msrb.mxu3 %v5239_v63  ;;  %v5296_v63 = vld [vmem:[#allocation2 + $0x2a8] sm:$0xff] }
  0x7c   :  { %1189 = vmatpush.bf16.msrb.mxu0 %v5246_v0  ;;  %v5304_v0 = vld [vmem:[#allocation2 + $0x2e8] sm:$0xff] }
  0x7d   :  { %1202 = vmatpush.bf16.msrb.mxu1 %v5254_v1  ;;  %v5311_v1 = vld [vmem:[#allocation2 + $0x720] sm:$0xff] }
  0x7e   :  { %1311 = vmatpush.bf16.msrb.mxu2 %v5230_v2  ;;  %v5319_v2 = vld [vmem:[#allocation2 + $0x760] sm:$0xff] }
  0x7f   :  { %1324 = vmatpush.bf16.msrb.mxu3 %v5238_v3 }
  0x80   :  { %1190 = vmatpush.bf16.msrb.mxu0 %v5245_v4 }
  0x81   :  { %1203 = vmatpush.bf16.msrb.mxu1 %v5253_v5  ;;  %v5295_v5 = vld [vmem:[#allocation2 + $0x2a0] sm:$0xff] }
  0x82   :  { %1312 = vmatpush.bf16.msrb.mxu2 %v5229_v6  ;;  %v5303_v6 = vld [vmem:[#allocation2 + $0x2e0] sm:$0xff] }
  0x83   :  { %1325 = vmatpush.bf16.msrb.mxu3 %v5237_v7 }
  0x84   :  { %1191 = vmatpush.bf16.msrb.mxu0 %v5244_v9  ;;  %v5318_v9 = vld [vmem:[#allocation2 + $0x758] sm:$0xff] }
  0x85   :  { %1204 = vmatpush.bf16.msrb.mxu1 %v5252_v10  ;;  %v5294_v10 = vld [vmem:[#allocation2 + $0x298] sm:$0xff] }
  0x86   :  { %1313 = vmatpush.bf16.msrb.mxu2 %v5228_v11  ;;  %v5302_v11 = vld [vmem:[#allocation2 + $0x2d8] sm:$0xff] }
  0x87   :  { %1326 = vmatpush.bf16.msrb.mxu3 %v5236_v12 }
  0x88   :  { %1192 = vmatpush.bf16.msrb.mxu0 %v5243_v13 }
  0x89   :  { %1205 = vmatpush.bf16.msrb.mxu1 %v5251_v14 }
  0x8a   :  { %1314 = vmatpush.bf16.msrb.mxu2 %v5227_v15  ;;  %v4442_v15 = vld [vmem:[%s5909_s2 + $0x20] sm:$0xff] }
  0x8b   :  { %1327 = vmatpush.bf16.msrb.mxu3 %v5235_v16  ;;  %1193 = vmatmul.bf16.vlgmr.msrb.gmra.mxu0 %v5578_v42  ;;  %v5309_v16 = vld [vmem:[#allocation2 + $0x710] sm:$0xff] }
  0x8c   :  { %1504 = vmatpush.bf16.msra.mxu0 %v5282_v17  ;;  %1206 = vmatmul.bf16.vlgmr.msrb.gmra.mxu1 %v5580_v43  ;;  %v5317_v17 = vld [vmem:[#allocation2 + $0x750] sm:$0xff] }
  0x8d   :  { %1517 = vmatpush.bf16.msra.mxu1 %v5290_v18  ;;  %1315 = vmatmul.bf16.vlgmr.msrb.gmra.mxu2 %v5574_v40 }
  0x8e   :  { %1626 = vmatpush.bf16.msra.mxu2 %v5266_v19  ;;  %1328 = vmatmul.bf16.vlgmr.msrb.gmra.mxu3 %v5576_v41 }
  0x8f   :  { %1639 = vmatpush.bf16.msra.mxu3 %v5274_v20  ;;  %1656 = vperm.xlu2 %5458, %v4442_v15   ;;  %v5324_v15 = vld [vmem:[#allocation2 + $0x308] sm:$0xff] }
  0x90   :  { %1505 = vmatpush.bf16.msra.mxu0 %v5281_v21  ;;  %v5293_v21 = vld [vmem:[#allocation2 + $0x290] sm:$0xff] }
  0x91   :  { %1518 = vmatpush.bf16.msra.mxu1 %v5289_v22  ;;  %v5301_v22 = vld [vmem:[#allocation2 + $0x2d0] sm:$0xff] }
  0x92   :  { %1627 = vmatpush.bf16.msra.mxu2 %v5265_v23  ;;  %v5308_v23 = vld [vmem:[#allocation2 + $0x708] sm:$0xff] }
  0x93   :  { %1640 = vmatpush.bf16.msra.mxu3 %v5273_v24  ;;  %v5316_v24 = vld [vmem:[#allocation2 + $0x748] sm:$0xff] }
  0x94   :  { %1506 = vmatpush.bf16.msra.mxu0 %v5280_v25  ;;  %v5292_v25 = vld [vmem:[#allocation2 + $0x288] sm:$0xff] }
  0x95   :  { %1519 = vmatpush.bf16.msra.mxu1 %v5288_v26  ;;  %v5300_v26 = vld [vmem:[#allocation2 + $0x2c8] sm:$0xff] }
  0x96   :  { %1628 = vmatpush.bf16.msra.mxu2 %v5264_v27 }
  0x97   :  { %1641 = vmatpush.bf16.msra.mxu3 %v5272_v28 }
  0x98   :  { %1507 = vmatpush.bf16.msra.mxu0 %v5279_v29  ;;  %v5307_v29 = vld [vmem:[#allocation2 + $0x700] sm:$0xff] }
  0x99   :  { %1520 = vmatpush.bf16.msra.mxu1 %v5287_v30  ;;  %v5315_v30 = vld [vmem:[#allocation2 + $0x740] sm:$0xff] }
  0x9a   :  { %1629 = vmatpush.bf16.msra.mxu2 %v5263_v31  ;;  %v5291_v31 = vld [vmem:[#allocation2 + $0x280] sm:$0xff] }
  0x9b   :  { %1642 = vmatpush.bf16.msra.mxu3 %v5271_v32  ;;  %v5299_v32 = vld [vmem:[#allocation2 + $0x2c0] sm:$0xff] }
  0x9c   :  { %1508 = vmatpush.bf16.msra.mxu0 %v5278_v33  ;;  %v5346_v33 = vld [vmem:[#allocation2 + $0x7b8] sm:$0xff] }
  0x9d   :  { %1521 = vmatpush.bf16.msra.mxu1 %v5286_v34  ;;  %v5354_v34 = vld [vmem:[#allocation2 + $0x7f8] sm:$0xff] }
  0x9e   :  { %1630 = vmatpush.bf16.msra.mxu2 %v5262_v35  ;;  %v5330_v35 = vld [vmem:[#allocation2 + $0x338] sm:$0xff] }
  0x9f   :  { %1643 = vmatpush.bf16.msra.mxu3 %v5270_v36  ;;  %v5338_v36 = vld [vmem:[#allocation2 + $0x378] sm:$0xff] }
  0xa0   :  { %1509 = vmatpush.bf16.msra.mxu0 %v5277_v37  ;;  %v5345_v37 = vld [vmem:[#allocation2 + $0x7b0] sm:$0xff] }
  0xa1   :  { %1522 = vmatpush.bf16.msra.mxu1 %v5285_v38  ;;  %v5353_v38 = vld [vmem:[#allocation2 + $0x7f0] sm:$0xff] }
  0xa2   :  { %1631 = vmatpush.bf16.msra.mxu2 %v5261_v39  ;;  %v5329_v39 = vld [vmem:[#allocation2 + $0x330] sm:$0xff] }
  0xa3   :  { %1644 = vmatpush.bf16.msra.mxu3 %v5269_v44  ;;  %v5337_v44 = vld [vmem:[#allocation2 + $0x370] sm:$0xff] }
  0xa4   :  { %1510 = vmatpush.bf16.msra.mxu0 %v5276_v45  ;;  %v5344_v45 = vld [vmem:[#allocation2 + $0x7a8] sm:$0xff] }
  0xa5   :  { %1523 = vmatpush.bf16.msra.mxu1 %v5284_v46  ;;  %v5352_v46 = vld [vmem:[#allocation2 + $0x7e8] sm:$0xff] }
  0xa6   :  { %1632 = vmatpush.bf16.msra.mxu2 %v5260_v47  ;;  %v5328_v47 = vld [vmem:[#allocation2 + $0x328] sm:$0xff] }
  0xa7   :  { %1645 = vmatpush.bf16.msra.mxu3 %v5268_v48  ;;  %v5336_v48 = vld [vmem:[#allocation2 + $0x368] sm:$0xff] }
  0xa8   :  { %1511 = vmatpush.bf16.msra.mxu0 %v5275_v49  ;;  %v238_v3 = vpop.f32.mrf.mxu0  ;;  %v381_v49 = vpop.permute.xlu0 %380 }
  0xa9   :  { %1524 = vmatpush.bf16.msra.mxu1 %v5283_v50  ;;  %v251_v4 = vpop.f32.mrf.mxu1  ;;  %v5343_v50 = vld [vmem:[#allocation2 + $0x7a0] sm:$0xff] }
  0xaa   :  { %1633 = vmatpush.bf16.msra.mxu2 %v5259_v51  ;;  %v252_v7 = vadd.f32 %v251_v4, %v238_v3  ;;  %v5351_v51 = vld [vmem:[#allocation2 + $0x7e0] sm:$0xff]  ;;  %v5341_v3 = vld [vmem:[#allocation2 + $0x790] sm:$0xff] }
  0xab   :  { %1646 = vmatpush.bf16.msra.mxu3 %v5267_v52  ;;  %1512 = vmatmul.bf16.vlgmr.msra.gmra.mxu0 %v5578_v42  ;;  %v5349_v4 = vld [vmem:[#allocation2 + $0x7d0] sm:$0xff] }
  0xac   :  { %1823 = vmatpush.bf16.msrb.mxu0 %v5314_v53  ;;  %1525 = vmatmul.bf16.vlgmr.msra.gmra.mxu1 %v5580_v43 }
  0xad   :  { %1836 = vmatpush.bf16.msrb.mxu1 %v5322_v54  ;;  %1634 = vmatmul.bf16.vlgmr.msra.gmra.mxu2 %v5574_v40  ;;  %v5327_v54 = vld [vmem:[#allocation2 + $0x320] sm:$0xff] }
  0xae   :  { %1945 = vmatpush.bf16.msrb.mxu2 %v5298_v55  ;;  %1647 = vmatmul.bf16.vlgmr.msra.gmra.mxu3 %v5576_v41  ;;  %v5335_v55 = vld [vmem:[#allocation2 + $0x360] sm:$0xff] }
  0xaf   :  { %1958 = vmatpush.bf16.msrb.mxu3 %v5306_v56 }
  0xb0   :  { %1824 = vmatpush.bf16.msrb.mxu0 %v5313_v57  ;;  %v360_v12 = vpop.f32.mrf.mxu2  ;;  %v240_v19 = vpop.f32.mrf.mxu0  ;;  %v5342_v57 = vld [vmem:[#allocation2 + $0x798] sm:$0xff] }
  0xb1   :  { %1837 = vmatpush.bf16.msrb.mxu1 %v5321_v58  ;;  %v373_v13 = vpop.f32.mrf.mxu3  ;;  %v361_v14 = vadd.f32 %v360_v12, %v252_v7  ;;  %v253_v20 = vpop.f32.mrf.mxu1  ;;  %v5350_v58 = vld [vmem:[#allocation2 + $0x7d8] sm:$0xff]  ;;  %v5325_v7 = vld [vmem:[#allocation2 + $0x310] sm:$0xff] }
  0xb2   :  { %1946 = vmatpush.bf16.msrb.mxu2 %v5297_v59  ;;  %v5326_v59 = vld [vmem:[#allocation2 + $0x318] sm:$0xff]  ;;  %v5347_v20 = vld [vmem:[#allocation2 + $0x7c0] sm:$0xff] }
  0xb3   :  { %1959 = vmatpush.bf16.msrb.mxu3 %v5305_v60  ;;  %v5617_v18 = vadd.f32 %v373_v13, %v361_v14  ;;  %v5334_v60 = vld [vmem:[#allocation2 + $0x358] sm:$0xff]  ;;  %v5340_v13 = vld [vmem:[#allocation2 + $0x788] sm:$0xff] }
  0xb4   :  { %1825 = vmatpush.bf16.msrb.mxu0 %v5312_v61  ;;  %v5348_v14 = vld [vmem:[#allocation2 + $0x7c8] sm:$0xff] }
  0xb5   :  { %1838 = vmatpush.bf16.msrb.mxu1 %v5320_v62 }
  0xb6   :  { %1947 = vmatpush.bf16.msrb.mxu2 %v5296_v63 }
  0xb7   :  { %1960 = vmatpush.bf16.msrb.mxu3 %v5304_v0  ;;  %v700_v0 = vpop.permute.xlu0 %699 }
  0xb8   :  { %1826 = vmatpush.bf16.msrb.mxu0 %v5311_v1  ;;  %v362_v27 = vpop.f32.mrf.mxu2  ;;  %v4571_v1 = vld [vmem:[%s5909_s2 + $0x28] sm:$0xff] }
  0xb9   :  { %1839 = vmatpush.bf16.msrb.mxu1 %v5319_v2  ;;  %v375_v28 = vpop.f32.mrf.mxu3  ;;  %1975 = vperm.xlu2 %5458, %v4571_v1   ;;  %v5377_v27 = vld [vmem:[#allocation2 + $0x830] sm:$0xff] }
  0xba   :  { %1948 = vmatpush.bf16.msrb.mxu2 %v5295_v5  ;;  %v5385_v28 = vld [vmem:[#allocation2 + $0x870] sm:$0xff] }
  0xbb   :  { %1961 = vmatpush.bf16.msrb.mxu3 %v5303_v6 }
  0xbc   :  { %1827 = vmatpush.bf16.msrb.mxu0 %v5310_v8  ;;  %v5333_v8 = vld [vmem:[#allocation2 + $0x350] sm:$0xff] }
  0xbd   :  { %1840 = vmatpush.bf16.msrb.mxu1 %v5318_v9  ;;  %v383_v9 = vmul.f32 %v381_v49, %v5617_v18  ;;  %v5339_v18 = vld [vmem:[#allocation2 + $0x780] sm:$0xff]  ;;  %v5102_v49 = vld [vmem:[%s5913_s6 + $0x18] sm:$0xff] }
  0xbe   :  { %1949 = vmatpush.bf16.msrb.mxu2 %v5294_v10 }
  0xbf   :  { %1962 = vmatpush.bf16.msrb.mxu3 %v5302_v11  ;;  %v4700_v11 = vld [vmem:[%s5909_s2 + $0x30] sm:$0xff] }
  0xc0   :  { %1828 = vmatpush.bf16.msrb.mxu0 %v5309_v16  ;;  %v5332_v16 = vld [vmem:[#allocation2 + $0x348] sm:$0xff]  ;;  %2294 = vperm.xlu0 %5456, %v4700_v11   ;;  %v5371_v11 = vld [vmem:[#allocation2 + $0x800] sm:$0xff] }
  0xc1   :  { %1841 = vmatpush.bf16.msrb.mxu1 %v5317_v17 }
  0xc2   :  { %1950 = vmatpush.bf16.msrb.mxu2 %v5293_v21  ;;  %v5323_v21 = vld [vmem:[#allocation2 + $0x300] sm:$0xff] }
  0xc3   :  { %1963 = vmatpush.bf16.msrb.mxu3 %v5301_v22  ;;  %v5331_v22 = vld [vmem:[#allocation2 + $0x340] sm:$0xff] }
  0xc4   :  { %1829 = vmatpush.bf16.msrb.mxu0 %v5308_v23  ;;  %v5378_v23 = vld [vmem:[#allocation2 + $0x838] sm:$0xff] }
  0xc5   :  { %1842 = vmatpush.bf16.msrb.mxu1 %v5316_v24  ;;  %v5386_v24 = vld [vmem:[#allocation2 + $0x878] sm:$0xff] }
  0xc6   :  { %1951 = vmatpush.bf16.msrb.mxu2 %v5292_v25  ;;  %v5362_v25 = vld [vmem:[#allocation2 + $0x3b8] sm:$0xff] }
  0xc7   :  { %1964 = vmatpush.bf16.msrb.mxu3 %v5300_v26  ;;  %v5370_v26 = vld [vmem:[#allocation2 + $0x3f8] sm:$0xff] }
  0xc8   :  { %1830 = vmatpush.bf16.msrb.mxu0 %v5307_v29  ;;  %v556_v52 = vpop.f32.mrf.mxu0  ;;  %v5361_v29 = vld [vmem:[#allocation2 + $0x3b0] sm:$0xff] }
  0xc9   :  { %1843 = vmatpush.bf16.msrb.mxu1 %v5315_v30  ;;  %v569_v53 = vpop.f32.mrf.mxu1  ;;  %v5369_v30 = vld [vmem:[#allocation2 + $0x3f0] sm:$0xff] }
  0xca   :  { %1952 = vmatpush.bf16.msrb.mxu2 %v5291_v31  ;;  %v570_v56 = vadd.f32 %v569_v53, %v556_v52  ;;  %v4829_v31 = vld [vmem:[%s5909_s2 + $0x38] sm:$0xff] }
  0xcb   :  { %1965 = vmatpush.bf16.msrb.mxu3 %v5299_v32  ;;  %1831 = vmatmul.bf16.vlgmr.msrb.gmra.mxu0 %v5578_v42  ;;  %v2937_v32 = vld [vmem:[%s5910_s3] sm:$0xff]  ;;  %v5358_v52 = vld [vmem:[#allocation2 + $0x398] sm:$0xff] }
  0xcc   :  { %2142 = vmatpush.bf16.msra.mxu0 %v5346_v33  ;;  %1844 = vmatmul.bf16.vlgmr.msrb.gmra.mxu1 %v5580_v43  ;;  %v5376_v33 = vld [vmem:[#allocation2 + $0x828] sm:$0xff]  ;;  %v5366_v53 = vld [vmem:[#allocation2 + $0x3d8] sm:$0xff] }
  0xcd   :  { %2155 = vmatpush.bf16.msra.mxu1 %v5354_v34  ;;  %1953 = vmatmul.bf16.vlgmr.msrb.gmra.mxu2 %v5574_v40  ;;  %v5384_v34 = vld [vmem:[#allocation2 + $0x868] sm:$0xff] }
  0xce   :  { %2264 = vmatpush.bf16.msra.mxu2 %v5330_v35  ;;  %1966 = vmatmul.bf16.vlgmr.msrb.gmra.mxu3 %v5576_v41  ;;  %v5360_v35 = vld [vmem:[#allocation2 + $0x3a8] sm:$0xff] }
  0xcf   :  { %2277 = vmatpush.bf16.msra.mxu3 %v5338_v36  ;;  %v5368_v36 = vld [vmem:[#allocation2 + $0x3e8] sm:$0xff]  ;;  %2613 = vperm.xlu1 %5457, %v4829_v31   ;;  %v5415_v31 = vld [vmem:[#allocation2 + $0x8e0] sm:$0xff] }
  0xd0   :  { %2143 = vmatpush.bf16.msra.mxu0 %v5345_v37  ;;  %v678_v61 = vpop.f32.mrf.mxu2  ;;  %v558_v5 = vpop.f32.mrf.mxu0  ;;  %2940 = vperm.xlu0 %5456, %v2937_v32   ;;  %v5375_v37 = vld [vmem:[#allocation2 + $0x820] sm:$0xff] }
  0xd1   :  { %2156 = vmatpush.bf16.msra.mxu1 %v5353_v38  ;;  %v691_v62 = vpop.f32.mrf.mxu3  ;;  %v679_v63 = vadd.f32 %v678_v61, %v570_v56  ;;  %v571_v6 = vpop.f32.mrf.mxu1  ;;  %v5383_v38 = vld [vmem:[#allocation2 + $0x860] sm:$0xff]  ;;  %v5372_v5 = vld [vmem:[#allocation2 + $0x808] sm:$0xff] }
  0xd2   :  { %2265 = vmatpush.bf16.msra.mxu2 %v5329_v39  ;;  %v5380_v6 = vld [vmem:[#allocation2 + $0x848] sm:$0xff] }
  0xd3   :  { %2278 = vmatpush.bf16.msra.mxu3 %v5337_v44  ;;  %v692_v2 = vadd.f32 %v691_v62, %v679_v63  ;;  %v5357_v63 = vld [vmem:[#allocation2 + $0x390] sm:$0xff] }
  0xd4   :  { %2144 = vmatpush.bf16.msra.mxu0 %v5344_v45  ;;  %v5359_v45 = vld [vmem:[#allocation2 + $0x3a0] sm:$0xff] }
  0xd5   :  { %2157 = vmatpush.bf16.msra.mxu1 %v5352_v46  ;;  %v702_v10 = vmul.f32 %v700_v0, %v692_v2  ;;  %v5367_v46 = vld [vmem:[#allocation2 + $0x3e0] sm:$0xff]  ;;  %v5365_v0 = vld [vmem:[#allocation2 + $0x3d0] sm:$0xff]  ;;  %v5094_v2 = vld [vmem:[%s5913_s6 + $0x8] sm:$0xff] }
  0xd6   :  { %2266 = vmatpush.bf16.msra.mxu2 %v5328_v47 }
  0xd7   :  { %2279 = vmatpush.bf16.msra.mxu3 %v5336_v48  ;;  %v5630_v12 = vadd.f32 %v702_v10, %v383_v9  ;;  %v2948_v48 = vld [vmem:[%s5913_s6] sm:$0xff] }
  0xd8   :  { %2145 = vmatpush.bf16.msra.mxu0 %v5343_v50  ;;  %v680_v17 = vpop.f32.mrf.mxu2  ;;  %v5374_v50 = vld [vmem:[#allocation2 + $0x818] sm:$0xff]  ;;  %2951 = vperm.xlu1 %5457, %v2948_v48  }
  0xd9   :  { %2158 = vmatpush.bf16.msra.mxu1 %v5351_v51  ;;  %v693_v19 = vpop.f32.mrf.mxu3  ;;  %v5382_v51 = vld [vmem:[#allocation2 + $0x858] sm:$0xff]  ;;  %3438 = vperm.xlu0 %5456, %v5102_v49  }
  0xda   :  { %2267 = vmatpush.bf16.msra.mxu2 %v5327_v54  ;;  %v5394_v17 = vld [vmem:[#allocation2 + $0x438] sm:$0xff] }
  0xdb   :  { %2280 = vmatpush.bf16.msra.mxu3 %v5335_v55  ;;  %v5402_v19 = vld [vmem:[#allocation2 + $0x478] sm:$0xff] }
  0xdc   :  { %2146 = vmatpush.bf16.msra.mxu0 %v5342_v57  ;;  %v1019_v57 = vpop.permute.xlu1 %1018 }
  0xdd   :  { %2159 = vmatpush.bf16.msra.mxu1 %v5350_v58 }
  0xde   :  { %2268 = vmatpush.bf16.msra.mxu2 %v5326_v59  ;;  %v5373_v59 = vld [vmem:[#allocation2 + $0x810] sm:$0xff] }
  0xdf   :  { %2281 = vmatpush.bf16.msra.mxu3 %v5334_v60  ;;  %v5381_v60 = vld [vmem:[#allocation2 + $0x850] sm:$0xff] }
  0xe0   :  { %2147 = vmatpush.bf16.msra.mxu0 %v5341_v3  ;;  %v5109_v3 = vld [vmem:[%s5913_s6 + $0x28] sm:$0xff]  ;;  %3360 = vperm.xlu1 %5457, %v5094_v2  }
  0xe1   :  { %2160 = vmatpush.bf16.msra.mxu1 %v5349_v4  ;;  %3505 = vperm.xlu0 %5456, %v5109_v3   ;;  %v5403_v3 = vld [vmem:[#allocation2 + $0x880] sm:$0xff] }
  0xe2   :  { %2269 = vmatpush.bf16.msra.mxu2 %v5325_v7  ;;  %v5356_v7 = vld [vmem:[#allocation2 + $0x388] sm:$0xff] }
  0xe3   :  { %2282 = vmatpush.bf16.msra.mxu3 %v5333_v8  ;;  %v5364_v8 = vld [vmem:[#allocation2 + $0x3c8] sm:$0xff] }
  0xe4   :  { %2148 = vmatpush.bf16.msra.mxu0 %v5340_v13  ;;  %v5379_v13 = vld [vmem:[#allocation2 + $0x840] sm:$0xff] }
  0xe5   :  { %2161 = vmatpush.bf16.msra.mxu1 %v5348_v14  ;;  %v5355_v14 = vld [vmem:[#allocation2 + $0x380] sm:$0xff] }
  0xe6   :  { %2270 = vmatpush.bf16.msra.mxu2 %v5324_v15  ;;  %v5363_v15 = vld [vmem:[#allocation2 + $0x3c0] sm:$0xff] }
  0xe7   :  { %2283 = vmatpush.bf16.msra.mxu3 %v5332_v16  ;;  %v5418_v16 = vld [vmem:[#allocation2 + $0x8f8] sm:$0xff] }
  0xe8   :  { %2149 = vmatpush.bf16.msra.mxu0 %v5339_v18  ;;  %v875_v39 = vpop.f32.mrf.mxu0  ;;  %v5409_v18 = vld [vmem:[#allocation2 + $0x8b0] sm:$0xff] }
  0xe9   :  { %2162 = vmatpush.bf16.msra.mxu1 %v5347_v20  ;;  %v888_v44 = vpop.f32.mrf.mxu1  ;;  %v5417_v20 = vld [vmem:[#allocation2 + $0x8f0] sm:$0xff] }
  0xea   :  { %2271 = vmatpush.bf16.msra.mxu2 %v5323_v21  ;;  %v889_v47 = vadd.f32 %v888_v44, %v875_v39  ;;  %v5393_v21 = vld [vmem:[#allocation2 + $0x430] sm:$0xff]  ;;  %v5414_v39 = vld [vmem:[#allocation2 + $0x8d8] sm:$0xff] }
  0xeb   :  { %2284 = vmatpush.bf16.msra.mxu3 %v5331_v22  ;;  %2150 = vmatmul.bf16.vlgmr.msra.gmra.mxu0 %v5578_v42  ;;  %v5401_v22 = vld [vmem:[#allocation2 + $0x470] sm:$0xff] }
  0xec   :  { %2461 = vmatpush.bf16.msrb.mxu0 %v5378_v23  ;;  %2163 = vmatmul.bf16.vlgmr.msra.gmra.mxu1 %v5580_v43  ;;  %v5117_v23 = vld [vmem:[%s5913_s6 + $0x30] sm:$0xff] }
  0xed   :  { %2474 = vmatpush.bf16.msrb.mxu1 %v5386_v24  ;;  %2272 = vmatmul.bf16.vlgmr.msra.gmra.mxu2 %v5574_v40  ;;  %v5125_v24 = vld [vmem:[%s5913_s6 + $0x40] sm:$0xff]  ;;  %v5101_v44 = vld [vmem:[%s5913_s6 + $0x10] sm:$0xff] }
  0xee   :  { %2583 = vmatpush.bf16.msrb.mxu2 %v5362_v25  ;;  %2285 = vmatmul.bf16.vlgmr.msra.gmra.mxu3 %v5576_v41  ;;  %v5408_v25 = vld [vmem:[#allocation2 + $0x8a8] sm:$0xff] }
  0xef   :  { %2596 = vmatpush.bf16.msrb.mxu3 %v5370_v26  ;;  %v5416_v26 = vld [vmem:[#allocation2 + $0x8e8] sm:$0xff]  ;;  %3653 = vperm.xlu1 %5457, %v5117_v23  }
  0xf0   :  { %2462 = vmatpush.bf16.msrb.mxu0 %v5377_v27  ;;  %v997_v54 = vpop.f32.mrf.mxu2  ;;  %v877_v61 = vpop.f32.mrf.mxu0  ;;  %v4958_v27 = vld [vmem:[%s5909_s2 + $0x40] sm:$0xff]  ;;  %3731 = vperm.xlu0 %5456, %v5125_v24  }
  0xf1   :  { %2475 = vmatpush.bf16.msrb.mxu1 %v5385_v28  ;;  %v1010_v55 = vpop.f32.mrf.mxu3  ;;  %v998_v56 = vadd.f32 %v997_v54, %v889_v47  ;;  %v890_v62 = vpop.f32.mrf.mxu1  ;;  %v5392_v28 = vld [vmem:[#allocation2 + $0x428] sm:$0xff]  ;;  %2932 = vperm.xlu2 %5458, %v4958_v27  }
  0xf2   :  { %2584 = vmatpush.bf16.msrb.mxu2 %v5361_v29  ;;  %v5400_v29 = vld [vmem:[#allocation2 + $0x468] sm:$0xff]  ;;  %v5107_v62 = vld [vmem:[%s5913_s6 + $0x20] sm:$0xff] }
  0xf3   :  { %2597 = vmatpush.bf16.msrb.mxu3 %v5369_v30  ;;  %v1011_v58 = vadd.f32 %v1010_v55, %v998_v56  ;;  %v5407_v30 = vld [vmem:[#allocation2 + $0x8a0] sm:$0xff]  ;;  %v5389_v56 = vld [vmem:[#allocation2 + $0x410] sm:$0xff]  ;;  %v5412_v61 = vld [vmem:[#allocation2 + $0x8c8] sm:$0xff] }
  0xf4   :  { %2463 = vmatpush.bf16.msrb.mxu0 %v5376_v33 }
  0xf5   :  { %2476 = vmatpush.bf16.msrb.mxu1 %v5384_v34  ;;  %v1021_v1 = vmul.f32 %v1019_v57, %v1011_v58  ;;  %v5391_v34 = vld [vmem:[#allocation2 + $0x420] sm:$0xff]  ;;  %v5397_v57 = vld [vmem:[#allocation2 + $0x450] sm:$0xff] }
  0xf6   :  { %2585 = vmatpush.bf16.msrb.mxu2 %v5360_v35  ;;  %v5399_v35 = vld [vmem:[#allocation2 + $0x460] sm:$0xff] }
  0xf7   :  { %2598 = vmatpush.bf16.msrb.mxu3 %v5368_v36  ;;  %v5655_v4 = vadd.f32 %v1021_v1, %v5630_v12  ;;  %v5410_v12 = vld [vmem:[#allocation2 + $0x8b8] sm:$0xff] }
  0xf8   :  { %2464 = vmatpush.bf16.msrb.mxu0 %v5375_v37  ;;  %v999_v9 = vpop.f32.mrf.mxu2  ;;  %v5130_v37 = vld [vmem:[%s5913_s6 + $0x48] sm:$0xff] }
  0xf9   :  { %2477 = vmatpush.bf16.msrb.mxu1 %v5383_v38  ;;  %v1012_v10 = vpop.f32.mrf.mxu3  ;;  %v5406_v38 = vld [vmem:[#allocation2 + $0x898] sm:$0xff]  ;;  %3785 = vperm.xlu1 %5457, %v5130_v37  }
  0xfa   :  { %2586 = vmatpush.bf16.msrb.mxu2 %v5359_v45  ;;  %v5390_v45 = vld [vmem:[#allocation2 + $0x418] sm:$0xff]  ;;  %3429 = vperm.xlu2 %5458, %v5101_v44  }
  0xfb   :  { %2599 = vmatpush.bf16.msrb.mxu3 %v5367_v46  ;;  %v5398_v46 = vld [vmem:[#allocation2 + $0x458] sm:$0xff] }
  0xfc   :  { %2465 = vmatpush.bf16.msrb.mxu0 %v5374_v50  ;;  %v1338_v50 = vpop.permute.xlu1 %1337 }
  0xfd   :  { %2478 = vmatpush.bf16.msrb.mxu1 %v5382_v51 }
  0xfe   :  { %2587 = vmatpush.bf16.msrb.mxu2 %v5358_v52  ;;  %v5405_v52 = vld [vmem:[#allocation2 + $0x890] sm:$0xff] }
  0xff   :  { %2600 = vmatpush.bf16.msrb.mxu3 %v5366_v53  ;;  %v5413_v53 = vld [vmem:[#allocation2 + $0x8d0] sm:$0xff] }
 0x100   :  { %2466 = vmatpush.bf16.msrb.mxu0 %v5373_v59 }
 0x101   :  { %2479 = vmatpush.bf16.msrb.mxu1 %v5381_v60  ;;  %v5404_v60 = vld [vmem:[#allocation2 + $0x888] sm:$0xff] }
 0x102   :  { %2588 = vmatpush.bf16.msrb.mxu2 %v5357_v63  ;;  %v5388_v63 = vld [vmem:[#allocation2 + $0x408] sm:$0xff]  ;;  %3492 = vperm.xlu2 %5458, %v5107_v62  }
 0x103   :  { %2601 = vmatpush.bf16.msrb.mxu3 %v5365_v0  ;;  %v5396_v0 = vld [vmem:[#allocation2 + $0x448] sm:$0xff] }
 0x104   :  { %2467 = vmatpush.bf16.msrb.mxu0 %v5372_v5  ;;  %v5411_v5 = vld [vmem:[#allocation2 + $0x8c0] sm:$0xff] }
 0x105   :  { %2480 = vmatpush.bf16.msrb.mxu1 %v5380_v6  ;;  %v5395_v6 = vld [vmem:[#allocation2 + $0x440] sm:$0xff] }
 0x106   :  { %2589 = vmatpush.bf16.msrb.mxu2 %v5356_v7  ;;  %v5124_v7 = vld [vmem:[%s5913_s6 + $0x38] sm:$0xff] }
 0x107   :  { %2602 = vmatpush.bf16.msrb.mxu3 %v5364_v8 }
 0x108   :  { %2468 = vmatpush.bf16.msrb.mxu0 %v5371_v11  ;;  %v1194_v32 = vpop.f32.mrf.mxu0 }
 0x109   :  { %2481 = vmatpush.bf16.msrb.mxu1 %v5379_v13  ;;  %v1207_v33 = vpop.f32.mrf.mxu1 }
 0x10a   :  { %2590 = vmatpush.bf16.msrb.mxu2 %v5355_v14  ;;  %v1208_v36 = vadd.f32 %v1207_v33, %v1194_v32  ;;  %3722 = vperm.xlu2 %5458, %v5124_v7  }
 0x10b   :  { %2603 = vmatpush.bf16.msrb.mxu3 %v5363_v15  ;;  %2469 = vmatmul.bf16.vlgmr.msrb.gmra.mxu0 %v5578_v42  ;;  %v1657_v15 = vpop.permute.xlu2 %1656 }
 0x10c   :  { %2780 = vmatpush.bf16.msra.mxu0 %v5410_v12  ;;  %2482 = vmatmul.bf16.vlgmr.msrb.gmra.mxu1 %v5580_v43 }
 0x10d   :  { %2793 = vmatpush.bf16.msra.mxu1 %v5418_v16  ;;  %2591 = vmatmul.bf16.vlgmr.msrb.gmra.mxu2 %v5574_v40 }
 0x10e   :  { %2902 = vmatpush.bf16.msra.mxu2 %v5394_v17  ;;  %2604 = vmatmul.bf16.vlgmr.msrb.gmra.mxu3 %v5576_v41 }
 0x10f   :  { %2915 = vmatpush.bf16.msra.mxu3 %v5402_v19 }
 0x110   :  { %2781 = vmatpush.bf16.msra.mxu0 %v5409_v18  ;;  %v1316_v47 = vpop.f32.mrf.mxu2  ;;  %v1196_v54 = vpop.f32.mrf.mxu0 }
 0x111   :  { %2794 = vmatpush.bf16.msra.mxu1 %v5417_v20  ;;  %v1329_v48 = vpop.f32.mrf.mxu3  ;;  %v1317_v49 = vadd.f32 %v1316_v47, %v1208_v36  ;;  %v1209_v55 = vpop.f32.mrf.mxu1  ;;  %v5687_v54 = vld [vmem:[#allocation4 + $0x38] sm:$0xff] }
 0x112   :  { %2903 = vmatpush.bf16.msra.mxu2 %v5393_v21  ;;  %v5689_v55 = vld [vmem:[#allocation4 + $0x78] sm:$0xff] }
 0x113   :  { %2916 = vmatpush.bf16.msra.mxu3 %v5401_v22  ;;  %v1330_v51 = vadd.f32 %v1329_v48, %v1317_v49  ;;  %v1976_v24 = vpop.permute.xlu2 %1975 }
 0x114   :  { %2782 = vmatpush.bf16.msra.mxu0 %v5408_v25 }
 0x115   :  { %2795 = vmatpush.bf16.msra.mxu1 %v5416_v26  ;;  %v1340_v58 = vmul.f32 %v1338_v50, %v1330_v51 }
 0x116   :  { %2904 = vmatpush.bf16.msra.mxu2 %v5392_v28 }
 0x117   :  { %2917 = vmatpush.bf16.msra.mxu3 %v5400_v29  ;;  %v1341_v59 = vadd.f32 %v1340_v58, %v5655_v4  ;;  %v5387_v4 = vld [vmem:[#allocation2 + $0x400] sm:$0xff]  ;;  %v5695_v58 = vld [vmem:[#allocation4 + $0x30] sm:$0xff] }
 0x118   :  { %2783 = vmatpush.bf16.msra.mxu0 %v5407_v30  ;;  %v1318_v1 = vpop.f32.mrf.mxu2 }
 0x119   :  { %2796 = vmatpush.bf16.msra.mxu1 %v5415_v31  ;;  %v1331_v2 = vpop.f32.mrf.mxu3  ;;  %v5704_v1 = vld [vmem:[#allocation4 + $0x28] sm:$0xff] }
 0x11a   :  { %2905 = vmatpush.bf16.msra.mxu2 %v5391_v34  ;;  %v5706_v2 = vld [vmem:[#allocation4 + $0x68] sm:$0xff] }
 0x11b   :  { %2918 = vmatpush.bf16.msra.mxu3 %v5399_v35 }
 0x11c   :  { %2784 = vmatpush.bf16.msra.mxu0 %v5406_v38 }
 0x11d   :  { %2797 = vmatpush.bf16.msra.mxu1 %v5414_v39 }
 0x11e   :  { %2906 = vmatpush.bf16.msra.mxu2 %v5390_v45 }
 0x11f   :  { %2919 = vmatpush.bf16.msra.mxu3 %v5398_v46 }
 0x120   :  { %2785 = vmatpush.bf16.msra.mxu0 %v5405_v52 }
 0x121   :  { %2798 = vmatpush.bf16.msra.mxu1 %v5413_v53 }
 0x122   :  { %2907 = vmatpush.bf16.msra.mxu2 %v5389_v56  ;;  %v5691_v56 = vld [vmem:[#allocation4 + $0xb8] sm:$0xff] }
 0x123   :  { %2920 = vmatpush.bf16.msra.mxu3 %v5397_v57 }
 0x124   :  { %2786 = vmatpush.bf16.msra.mxu0 %v5404_v60  ;;  %v5700_v60 = vld [vmem:[#allocation4 + $0xb0] sm:$0xff] }
 0x125   :  { %2799 = vmatpush.bf16.msra.mxu1 %v5412_v61 }
 0x126   :  { %2908 = vmatpush.bf16.msra.mxu2 %v5388_v63 }
 0x127   :  { %2921 = vmatpush.bf16.msra.mxu3 %v5396_v0 }
 0x128   :  { %2787 = vmatpush.bf16.msra.mxu0 %v5403_v3  ;;  %v1513_v8 = vpop.f32.mrf.mxu0 }
 0x129   :  { %2800 = vmatpush.bf16.msra.mxu1 %v5411_v5  ;;  %v1526_v9 = vpop.f32.mrf.mxu1  ;;  %v5709_v5 = vld [vmem:[#allocation4 + $0xa8] sm:$0xff] }
 0x12a   :  { %2909 = vmatpush.bf16.msra.mxu2 %v5387_v4  ;;  %v1527_v10 = vadd.f32 %v1526_v9, %v1513_v8  ;;  %v5713_v9 = vld [vmem:[#allocation4 + $0x20] sm:$0xff] }
 0x12b   :  { %2922 = vmatpush.bf16.msra.mxu3 %v5395_v6  ;;  %2788 = vmatmul.bf16.vlgmr.msra.gmra.mxu0 %v5578_v42 }
 0x12c   :  { %2801 = vmatmul.bf16.vlgmr.msra.gmra.mxu1 %v5580_v43 }
 0x12d   :  { %2910 = vmatmul.bf16.vlgmr.msra.gmra.mxu2 %v5574_v40  ;;  %3041 = vmatpush.bf16.msrb.mxu1 %v5687_v54 }
 0x12e   :  { %2923 = vmatmul.bf16.vlgmr.msra.gmra.mxu3 %v5576_v41  ;;  %3120 = vmatpush.bf16.msrb.mxu2 %v5689_v55 }
 0x12f   :  { %3199 = vmatpush.bf16.msrb.mxu3 %v5691_v56 }
 0x130   :  { %v1635_v11 = vpop.f32.mrf.mxu2  ;;  %v1515_v16 = vpop.f32.mrf.mxu0 }
 0x131   :  { %v1648_v13 = vpop.f32.mrf.mxu3  ;;  %v1636_v14 = vadd.f32 %v1635_v11, %v1527_v10  ;;  %v1528_v17 = vpop.f32.mrf.mxu1  ;;  %3042 = vmatpush.bf16.msrb.mxu1 %v5695_v58  ;;  %v5715_v10 = vld [vmem:[#allocation4 + $0x60] sm:$0xff] }
 0x132   :  { %v2295_v3 = vpop.permute.xlu0 %2294 }
 0x133   :  { %v1649_v12 = vadd.f32 %v1648_v13, %v1636_v14  ;;  %3200 = vmatpush.bf16.msrb.mxu3 %v5700_v60  ;;  %v5718_v14 = vld [vmem:[#allocation4 + $0xa0] sm:$0xff] }
 0x135   :  { %v1659_v19 = vmul.f32 %v1657_v15, %v1649_v12  ;;  %3043 = vmatpush.bf16.msrb.mxu1 %v5704_v1 }
 0x137   :  { %v1660_v18 = vadd.f32 %v1659_v19, %v1341_v59  ;;  %v5697_v59 = vld [vmem:[#allocation4 + $0x70] sm:$0xff]  ;;  %3201 = vmatpush.bf16.msrb.mxu3 %v5709_v5 }
 0x138   :  { %v1637_v42 = vpop.f32.mrf.mxu2  ;;  %3121 = vmatpush.bf16.msrb.mxu2 %v5697_v59 }
 0x139   :  { %v1650_v20 = vpop.f32.mrf.mxu3  ;;  %3044 = vmatpush.bf16.msrb.mxu1 %v5713_v9  ;;  %v5722_v42 = vld [vmem:[#allocation4 + $0x18] sm:$0xff] }
 0x13a   :  { %v5724_v20 = vld [vmem:[#allocation4 + $0x58] sm:$0xff] }
 0x13b   :  { %3202 = vmatpush.bf16.msrb.mxu3 %v5718_v14 }
 0x13c   :  { %3122 = vmatpush.bf16.msrb.mxu2 %v5706_v2 }
 0x13d   :  { %3045 = vmatpush.bf16.msrb.mxu1 %v5722_v42 }
 0x140   :  { %3123 = vmatpush.bf16.msrb.mxu2 %v5715_v10 }
 0x141   :  { %v2614_v8 = vpop.permute.xlu1 %2613 }
 0x144   :  { %3124 = vmatpush.bf16.msrb.mxu2 %v5724_v20 }
 0x148   :  { %v1832_v43 = vpop.f32.mrf.mxu0 }
 0x149   :  { %v1845_v21 = vpop.f32.mrf.mxu1 }
 0x14a   :  { %v1846_v40 = vadd.f32 %v1845_v21, %v1832_v43  ;;  %v5727_v21 = vld [vmem:[#allocation4 + $0x98] sm:$0xff] }
 0x14b   :  { %v2933_v43 = vpop.permute.xlu2 %2932  ;;  %3203 = vmatpush.bf16.msrb.mxu3 %v5727_v21 }
 0x150   :  { %v1954_v22 = vpop.f32.mrf.mxu2  ;;  %v1834_v26 = vpop.f32.mrf.mxu0 }
 0x151   :  { %v1967_v41 = vpop.f32.mrf.mxu3  ;;  %v1955_v23 = vadd.f32 %v1954_v22, %v1846_v40  ;;  %v1847_v27 = vpop.f32.mrf.mxu1 }
 0x153   :  { %v1968_v25 = vadd.f32 %v1967_v41, %v1955_v23  ;;  %v2941_v41 = vpop.permute.xlu0 %2940 }
 0x155   :  { %v1978_v28 = vmul.f32 %v1976_v24, %v1968_v25  ;;  %v5731_v24 = vld [vmem:[#allocation4 + $0x10] sm:$0xff] }
 0x156   :  { %v5733_v25 = vld [vmem:[#allocation4 + $0x50] sm:$0xff]  ;;  %3046 = vmatpush.bf16.msrb.mxu1 %v5731_v24 }
 0x157   :  { %v1979_v29 = vadd.f32 %v1978_v28, %v1660_v18  ;;  %v5736_v28 = vld [vmem:[#allocation4 + $0x90] sm:$0xff]  ;;  %3125 = vmatpush.bf16.msrb.mxu2 %v5733_v25 }
 0x158   :  { %v1956_v30 = vpop.f32.mrf.mxu2  ;;  %3204 = vmatpush.bf16.msrb.mxu3 %v5736_v28 }
 0x159   :  { %v1969_v31 = vpop.f32.mrf.mxu3 }
 0x168   :  { %v2151_v32 = vpop.f32.mrf.mxu0 }
 0x169   :  { %v2164_v33 = vpop.f32.mrf.mxu1 }
 0x16a   :  { %v2165_v52 = vadd.f32 %v2164_v33, %v2151_v32  ;;  %v5745_v33 = vld [vmem:[#allocation4 + $0xf8] sm:$0xff] }
 0x170   :  { %v2273_v34 = vpop.f32.mrf.mxu2  ;;  %v2153_v36 = vpop.f32.mrf.mxu0 }
 0x171   :  { %v2286_v35 = vpop.f32.mrf.mxu3  ;;  %v2166_v37 = vpop.f32.mrf.mxu1  ;;  %v2274_v57 = vadd.f32 %v2273_v34, %v2165_v52  ;;  %v5752_v36 = vld [vmem:[#allocation4 + $0xf0] sm:$0xff]  ;;  %v5784_v52 = vld [vmem:[#allocation4 + $0xc0] sm:$0xff] }
 0x172   :  { %v5756_v37 = vld [vmem:[#allocation4 + $0xe8] sm:$0xff] }
 0x173   :  { %v2287_v0 = vadd.f32 %v2286_v35, %v2274_v57  ;;  %v2946_v35 = vld [vmem:[%s5912_s5] sm:$0xf] }
 0x175   :  { %v2297_v7 = vmul.f32 %v2295_v3, %v2287_v0 }
 0x177   :  { %v2298_v19 = vadd.f32 %v2297_v7, %v1979_v29 }
 0x178   :  { %v2275_v38 = vpop.f32.mrf.mxu2 }
 0x179   :  { %v2288_v39 = vpop.f32.mrf.mxu3  ;;  %v5759_v38 = vld [vmem:[#allocation4 + $0xe0] sm:$0xff] }
 0x17a   :  { %v5762_v39 = vld [vmem:[#allocation4 + $0xd8] sm:$0xff] }
 0x188   :  { %v2470_v44 = vpop.f32.mrf.mxu0 }
 0x189   :  { %v2483_v45 = vpop.f32.mrf.mxu1 }
 0x18a   :  { %v2484_v53 = vadd.f32 %v2483_v45, %v2470_v44  ;;  %v5765_v44 = vld [vmem:[#allocation4 + $0xd0] sm:$0xff]  ;;  %v5768_v45 = vld [vmem:[#allocation4 + $0x8] sm:$0xff] }
 0x18b   :  { %3047 = vmatpush.bf16.msrb.mxu1 %v5768_v45 }
 0x190   :  { %v2592_v46 = vpop.f32.mrf.mxu2  ;;  %v2472_v48 = vpop.f32.mrf.mxu0 }
 0x191   :  { %v2605_v47 = vpop.f32.mrf.mxu3  ;;  %v2485_v49 = vpop.f32.mrf.mxu1  ;;  %v2593_v61 = vadd.f32 %v2592_v46, %v2484_v53  ;;  %v5770_v46 = vld [vmem:[#allocation4 + $0x48] sm:$0xff] }
 0x192   :  { %v5774_v48 = vld [vmem:[#allocation4 + $0xc8] sm:$0xff]  ;;  %3126 = vmatpush.bf16.msrb.mxu2 %v5770_v46  ;;  %v5419_v49 = vld [vmem:[#allocation4] sm:$0xff]  ;;  %v2952_v53 = vpop.permute.xlu1 %2951 }
 0x193   :  { %v2606_v4 = vadd.f32 %v2605_v47, %v2593_v61  ;;  %v5772_v47 = vld [vmem:[#allocation4 + $0x88] sm:$0xff]  ;;  %3048 = vmatpush.bf16.msrb.mxu1 %v5419_v49 }
 0x194   :  { %3205 = vmatpush.bf16.msrb.mxu3 %v5772_v47 }
 0x195   :  { %v2616_v15 = vmul.f32 %v2614_v8, %v2606_v4  ;;  %v5089_v4 = vld [vmem:[%s5912_s5 + $0x8] sm:$0xf] }
 0x197   :  { %v2617_v40 = vadd.f32 %v2616_v15, %v2298_v19 }
 0x198   :  { %v2594_v50 = vpop.f32.mrf.mxu2 }
 0x199   :  { %v2607_v51 = vpop.f32.mrf.mxu3  ;;  %v5780_v50 = vld [vmem:[#allocation4 + $0x40] sm:$0xff] }
 0x19a   :  { %v5782_v51 = vld [vmem:[#allocation4 + $0x80] sm:$0xff]  ;;  %3127 = vmatpush.bf16.msrb.mxu2 %v5780_v50 }
 0x19b   :  { %3206 = vmatpush.bf16.msrb.mxu3 %v5782_v51 }
 0x1a8   :  { %v2789_v62 = vpop.f32.mrf.mxu0 }
 0x1a9   :  { %v2802_v63 = vpop.f32.mrf.mxu1 }
 0x1aa   :  { %v2803_v6 = vadd.f32 %v2802_v63, %v2789_v62 }
 0x1b0   :  { %v2911_v11 = vpop.f32.mrf.mxu2  ;;  %v2791_v16 = vpop.f32.mrf.mxu0 }
 0x1b1   :  { %v2924_v13 = vpop.f32.mrf.mxu3  ;;  %v2912_v12 = vadd.f32 %v2911_v11, %v2803_v6  ;;  %v2804_v17 = vpop.f32.mrf.mxu1  ;;  %v5096_v6 = vld [vmem:[%s5912_s5 + $0x14] sm:$0xf]  ;;  %v5088_v16 = vld [vmem:[%s5912_s5 + $0x4] sm:$0xf] }
 0x1b3   :  { %v2925_v18 = vadd.f32 %v2924_v13, %v2912_v12 }
 0x1b5   :  { %v2935_v22 = vmul.f32 %v2933_v43, %v2925_v18 }
 0x1b7   :  { %v2936_v23 = vadd.f32 %v2935_v22, %v2617_v40 }
 0x1b8   :  { %v2913_v26 = vpop.f32.mrf.mxu2 }
 0x1b9   :  { %v2926_v27 = vpop.f32.mrf.mxu3  ;;  %v2943_v29 = vadd.f32 %v2941_v41, %v2936_v23  ;;  %v5092_v26 = vld [vmem:[%s5912_s5 + $0xc] sm:$0xf] }
 0x1ba   :  { %v5095_v27 = vld [vmem:[%s5912_s5 + $0x10] sm:$0xf] }
 0x1bb   :  { %v2944_v30 = vmax.f32 %v2943_v29, 0.0 }
 0x1bd   :  { %v5741_v31 = vmin.f32 %v2944_v30, 3.0  ;;  %v5099_v30 = vld [vmem:[%s5912_s5 + $0x18] sm:$0xf] }
 0x1bf   :  { %v2947_v32 = vpack.c.bf16 %v5741_v31, %v5741_v31 }
 0x1c1   :  { %v2960_v34 = vsel %vm2958_vm0, %v2947_v32, 0 }
 0x1c2   :  { %2969 = vmatpush.bf16.msrb.mxu0 %v2960_v34 }
 0x1c5   :  { %4959 = vmatmul.msk.bf16.vlgmr.msrb.gmra.mxu0 %vm2954_vm1, %v2946_v35 }
 0x1c6   :  { %3278 = vmatpush.bf16.msra.mxu0 %v5745_v33 }
 0x1ca   :  { %3279 = vmatpush.bf16.msra.mxu0 %v5752_v36 }
 0x1ce   :  { %3280 = vmatpush.bf16.msra.mxu0 %v5756_v37 }
 0x1d2   :  { %3281 = vmatpush.bf16.msra.mxu0 %v5759_v38 }
 0x1d6   :  { %3282 = vmatpush.bf16.msra.mxu0 %v5762_v39 }
 0x1da   :  { %3283 = vmatpush.bf16.msra.mxu0 %v5765_v44 }
 0x1de   :  { %3284 = vmatpush.bf16.msra.mxu0 %v5774_v48 }
 0x1e2   :  { %3285 = vmatpush.bf16.msra.mxu0 %v5784_v52 }
 0x242   :  { %v2971_v57 = vpop.f32.mrf.mxu0 }
 0x243   :  { %v2972_v61 = vadd.f32 %v2971_v57, %v2952_v53 }
 0x245   :  { %v2975_v62 = vmax.f32 %v2972_v61, 0.0 }
 0x247   :  { %v2976_v63 = vpack.c.bf16 %v2975_v62, %v2975_v62 }
 0x249   :  { %3049 = vmatmul.bf16.vlgmr.msrb.gmra.mxu1 %v2976_v63  ;;  %3128 = vmatmul.bf16.vlgmr.msrb.gmra.mxu2 %v2976_v63  ;;  %v3300_v0 = vsel %vm2958_vm0, %v2976_v63, 0 }
 0x24a   :  { %3207 = vmatmul.bf16.vlgmr.msrb.gmra.mxu3 %v2976_v63  ;;  %3286 = vmatmul.bf16.vlgmr.msra.gmra.mxu0 %v2976_v63  ;;  %v2973_v3 = vpop.f32.mrf.mxu0  ;;  %v3361_v63 = vpop.permute.xlu1 %3360 }
 0x24b   :  { %3309 = vmatpush.bf16.msra.mxu1 %v3300_v0  ;;  %3378 = vmatpush.bf16.msrb.mxu0 %v3300_v0 }
 0x259   :  { %5090 = vmatmul.msk.bf16.vlgmr.msra.gmra.mxu1 %vm2954_vm1, %v5089_v4 }
 0x25a   :  { %5097 = vmatmul.msk.bf16.vlgmr.msrb.gmra.mxu0 %vm2954_vm1, %v5096_v6 }
 0x2c6   :  { %v3050_v7 = vpop.f32.mrf.mxu1 }
 0x2c7   :  { %v3054_v8 = vpack.c.bf16 %v3050_v7, %v3050_v7  ;;  %v3287_v11 = vpop.f32.mrf.mxu0 }
 0x2c8   :  { %v3291_v13 = vpack.c.bf16 %v3287_v11, %v3287_v11 }
 0x2c9   :  { %v3319_v15 = vsel %vm2958_vm0, %v3054_v8, 0 }
 0x2ca   :  { %v3409_v12 = vsel %vm2958_vm0, %v3291_v13, 0  ;;  %3328 = vmatpush.bf16.msra.mxu2 %v3319_v15  ;;  %v3430_v13 = vpop.permute.xlu2 %3429  ;;  %v5103_v15 = vld [vmem:[%s5912_s5 + $0x1c] sm:$0xf] }
 0x2cc   :  { %v3129_v17 = vpop.f32.mrf.mxu2 }
 0x2cd   :  { %v3133_v19 = vpack.c.bf16 %v3129_v17, %v3129_v17  ;;  %v3208_v18 = vpop.f32.mrf.mxu3  ;;  %5091 = vmatmul.msk.bf16.vlgmr.msra.gmra.mxu2 %vm2954_vm1, %v5088_v16 }
 0x2ce   :  { %3418 = vmatpush.bf16.msrb.mxu2 %v3409_v12  ;;  %v3212_v43 = vpack.c.bf16 %v3208_v18, %v3208_v18  ;;  %v3052_v40 = vpop.f32.mrf.mxu1 }
 0x2cf   :  { %v3340_v22 = vsel %vm2958_vm0, %v3133_v19, 0  ;;  %v3289_v41 = vpop.f32.mrf.mxu0  ;;  %v5104_v40 = vld [vmem:[%s5912_s5 + $0x20] sm:$0xf] }
 0x2d0   :  { %v3388_v23 = vsel %vm2958_vm0, %v3212_v43, 0  ;;  %3349 = vmatpush.bf16.msra.mxu3 %v3340_v22  ;;  %v5118_v22 = vld [vmem:[%s5912_s5 + $0x34] sm:$0xf] }
 0x2d1   :  { %3397 = vmatpush.bf16.msrb.mxu1 %v3388_v23 }
 0x2d2   :  { %3529 = vmatpush.bf16.msra.mxu2 %v5687_v54 }
 0x2d3   :  { %5093 = vmatmul.msk.bf16.vlgmr.msra.gmra.mxu3 %vm2954_vm1, %v5092_v26 }
 0x2d4   :  { %v3131_v54 = vpop.f32.mrf.mxu2  ;;  %5098 = vmatmul.msk.bf16.vlgmr.msrb.gmra.mxu1 %vm2954_vm1, %v5095_v27 }
 0x2d5   :  { %v3210_v29 = vpop.f32.mrf.mxu3 }
 0x2d6   :  { %3530 = vmatpush.bf16.msra.mxu2 %v5695_v58  ;;  %v3311_v58 = vpop.f32.mrf.mxu1 }
 0x2d7   :  { %v3380_v34 = vpop.f32.mrf.mxu0 }
 0x2da   :  { %3531 = vmatpush.bf16.msra.mxu2 %v5704_v1 }
 0x2dd   :  { %5100 = vmatmul.msk.bf16.vlgmr.msrb.gmra.mxu2 %vm2954_vm1, %v5099_v30 }
 0x2de   :  { %3532 = vmatpush.bf16.msra.mxu2 %v5713_v9  ;;  %v3313_v32 = vpop.f32.mrf.mxu1 }
 0x2df   :  { %v3382_v35 = vpop.f32.mrf.mxu0 }
 0x2e0   :  { %v5111_v35 = vld [vmem:[%s5912_s5 + $0x28] sm:$0xf] }
 0x2e2   :  { %3533 = vmatpush.bf16.msra.mxu2 %v5722_v42  ;;  %v3439_v42 = vpop.permute.xlu0 %3438 }
 0x2e6   :  { %3534 = vmatpush.bf16.msra.mxu2 %v5731_v24 }
 0x2ea   :  { %3535 = vmatpush.bf16.msra.mxu2 %v5768_v45 }
 0x2ee   :  { %3536 = vmatpush.bf16.msra.mxu2 %v5419_v49 }
 0x350   :  { %v3330_v1 = vpop.f32.mrf.mxu2 }
 0x351   :  { %v3399_v53 = vpop.f32.mrf.mxu1  ;;  %v3331_v57 = vadd.f32 %v3330_v1, %v3311_v58  ;;  %v5115_v1 = vld [vmem:[%s5912_s5 + $0x30] sm:$0xf] }
 0x352   :  { %v3400_v24 = vadd.f32 %v3399_v53, %v3380_v34 }
 0x356   :  { %v3351_v61 = vpop.f32.mrf.mxu3 }
 0x357   :  { %v3355_v62 = vadd.f32 %v3351_v61, %v3331_v57  ;;  %v5122_v61 = vld [vmem:[%s5912_s5 + $0x3c] sm:$0xf] }
 0x358   :  { %v3332_v9 = vpop.f32.mrf.mxu2 }
 0x359   :  { %v3363_v0 = vadd.f32 %v3361_v63, %v3355_v62  ;;  %v3401_v3 = vpop.f32.mrf.mxu1 }
 0x35b   :  { %v3435_v4 = vmax.f32 %v3363_v0, 0.0 }
 0x35d   :  { %v3441_v6 = vmin.f32 %v3435_v4, %v3439_v42 }
 0x35e   :  { %v3353_v7 = vpop.f32.mrf.mxu3 }
 0x35f   :  { %v3446_v45 = vpack.c.bf16 %v3441_v6, %v3441_v6 }
 0x360   :  { %v3420_v49 = vpop.f32.mrf.mxu2 }
 0x361   :  { %v3424_v8 = vadd.f32 %v3420_v49, %v3400_v24  ;;  %v3473_v11 = vsel %vm2958_vm0, %v3446_v45, 0  ;;  %v3654_v49 = vpop.permute.xlu1 %3653 }
 0x362   :  { %3482 = vmatpush.bf16.msra.mxu0 %v3473_v11 }
 0x363   :  { %v3432_v12 = vadd.f32 %v3430_v13, %v3424_v8 }
 0x365   :  { %v3442_v16 = vmax.f32 %v3432_v12, 0.0  ;;  %5106 = vmatmul.msk.bf16.vlgmr.msra.gmra.mxu0 %vm2954_vm1, %v5103_v15 }
 0x366   :  { %3557 = vmatpush.bf16.msrb.mxu0 %v5691_v56 }
 0x367   :  { %v3443_v17 = vmin.f32 %v3442_v16, %v3439_v42 }
 0x368   :  { %v3422_v19 = vpop.f32.mrf.mxu2 }
 0x369   :  { %v3449_v18 = vpack.c.bf16 %v3443_v17, %v3443_v17 }
 0x36a   :  { %3558 = vmatpush.bf16.msrb.mxu0 %v5700_v60 }
 0x36b   :  { %v3454_v43 = vsel %vm2958_vm0, %v3449_v18, 0  ;;  %v5126_v18 = vld [vmem:[%s5912_s5 + $0x40] sm:$0xf] }
 0x36c   :  { %3463 = vmatpush.bf16.msrb.mxu3 %v3454_v43 }
 0x36e   :  { %3559 = vmatpush.bf16.msrb.mxu0 %v5709_v5 }
 0x36f   :  { %5105 = vmatmul.msk.bf16.vlgmr.msrb.gmra.mxu3 %vm2954_vm1, %v5104_v40 }
 0x370   :  { %3543 = vmatpush.bf16.msra.mxu3 %v5689_v55 }
 0x372   :  { %3560 = vmatpush.bf16.msrb.mxu0 %v5718_v14 }
 0x374   :  { %3544 = vmatpush.bf16.msra.mxu3 %v5697_v59 }
 0x376   :  { %3561 = vmatpush.bf16.msrb.mxu0 %v5727_v21 }
 0x378   :  { %3545 = vmatpush.bf16.msra.mxu3 %v5706_v2  ;;  %v3493_v2 = vpop.permute.xlu2 %3492 }
 0x37a   :  { %3562 = vmatpush.bf16.msrb.mxu0 %v5736_v28 }
 0x37c   :  { %3546 = vmatpush.bf16.msra.mxu3 %v5715_v10 }
 0x37e   :  { %3563 = vmatpush.bf16.msrb.mxu0 %v5772_v47 }
 0x380   :  { %3547 = vmatpush.bf16.msra.mxu3 %v5724_v20 }
 0x382   :  { %3564 = vmatpush.bf16.msrb.mxu0 %v5782_v51 }
 0x384   :  { %3548 = vmatpush.bf16.msra.mxu3 %v5733_v25  ;;  %v5108_v25 = vld [vmem:[%s5912_s5 + $0x24] sm:$0xf] }
 0x388   :  { %3549 = vmatpush.bf16.msra.mxu3 %v5770_v46 }
 0x38c   :  { %3550 = vmatpush.bf16.msra.mxu3 %v5780_v50 }
 0x3e2   :  { %v3484_v55 = vpop.f32.mrf.mxu0 }
 0x3ea   :  { %v3486_v56 = vpop.f32.mrf.mxu0 }
 0x3f2   :  { %v3465_v59 = vpop.f32.mrf.mxu3 }
 0x3f3   :  { %v3485_v60 = vadd.f32 %v3484_v55, %v3465_v59  ;;  %v3723_v55 = vpop.permute.xlu2 %3722 }
 0x3f5   :  { %v3495_v5 = vadd.f32 %v3493_v2, %v3485_v60 }
 0x3f7   :  { %v3496_v14 = vmax.f32 %v3495_v5, 0.0 }
 0x3f9   :  { %v3497_v10 = vadd.f32 %v3496_v14, %v5741_v31  ;;  %v3506_v31 = vpop.permute.xlu0 %3505 }
 0x3fa   :  { %v3467_v21 = vpop.f32.mrf.mxu3 }
 0x3fb   :  { %v3500_v28 = vpack.c.bf16 %v3497_v10, %v3497_v10  ;;  %v5127_v10 = vld [vmem:[%s5912_s5 + $0x44] sm:$0xf] }
 0x3fd   :  { %v3512_v20 = vsel %vm2958_vm0, %v3500_v28, 0 }
 0x3fe   :  { %3521 = vmatpush.bf16.msra.mxu1 %v3512_v20 }
 0x401   :  { %5110 = vmatmul.msk.bf16.vlgmr.msra.gmra.mxu1 %vm2954_vm1, %v5108_v25  ;;  %v3732_v13 = vpop.permute.xlu0 %3731 }
 0x402   :  { %3571 = vmatpush.bf16.msrb.mxu1 %v5745_v33 }
 0x406   :  { %3572 = vmatpush.bf16.msrb.mxu1 %v5752_v36 }
 0x40a   :  { %3573 = vmatpush.bf16.msrb.mxu1 %v5756_v37 }
 0x40e   :  { %3574 = vmatpush.bf16.msrb.mxu1 %v5759_v38  ;;  %v5112_v38 = vld [vmem:[%s5912_s5 + $0x2c] sm:$0xf] }
 0x412   :  { %3575 = vmatpush.bf16.msrb.mxu1 %v5762_v39  ;;  %v5119_v39 = vld [vmem:[%s5912_s5 + $0x38] sm:$0xf] }
 0x416   :  { %3576 = vmatpush.bf16.msrb.mxu1 %v5765_v44 }
 0x41a   :  { %3577 = vmatpush.bf16.msrb.mxu1 %v5774_v48 }
 0x41e   :  { %3578 = vmatpush.bf16.msrb.mxu1 %v5784_v52 }
 0x47e   :  { %v3523_v46 = vpop.f32.mrf.mxu1 }
 0x47f   :  { %v3524_v47 = vadd.f32 %v3523_v46, %v3506_v31  ;;  %v3786_v31 = vpop.permute.xlu1 %3785 }
 0x481   :  { %v3527_v33 = vmax.f32 %v3524_v47, 0.0 }
 0x483   :  { %v3528_v50 = vpack.c.bf16 %v3527_v33, %v3527_v33 }
 0x485   :  { %3537 = vmatmul.bf16.vlgmr.msra.gmra.mxu2 %v3528_v50  ;;  %3551 = vmatmul.bf16.vlgmr.msra.gmra.mxu3 %v3528_v50  ;;  %v3593_v36 = vsel %vm2958_vm0, %v3528_v50, 0 }
 0x486   :  { %3565 = vmatmul.bf16.vlgmr.msrb.gmra.mxu0 %v3528_v50  ;;  %3579 = vmatmul.bf16.vlgmr.msrb.gmra.mxu1 %v3528_v50  ;;  %v3525_v37 = vpop.f32.mrf.mxu1 }
 0x487   :  { %3602 = vmatpush.bf16.msrb.mxu2 %v3593_v36  ;;  %3671 = vmatpush.bf16.msra.mxu1 %v3593_v36 }
 0x495   :  { %5113 = vmatmul.msk.bf16.vlgmr.msrb.gmra.mxu2 %vm2954_vm1, %v5112_v38 }
 0x496   :  { %5120 = vmatmul.msk.bf16.vlgmr.msra.gmra.mxu1 %vm2954_vm1, %v5119_v39 }
 0x503   :  { %v3566_v44 = vpop.f32.mrf.mxu0  ;;  %v3580_v48 = vpop.f32.mrf.mxu1 }
 0x504   :  { %v3570_v51 = vpack.c.bf16 %v3566_v44, %v3566_v44  ;;  %v3584_v41 = vpack.c.bf16 %v3580_v48, %v3580_v48 }
 0x506   :  { %v3681_v52 = vsel %vm2958_vm0, %v3570_v51, 0  ;;  %v3702_v34 = vsel %vm2958_vm0, %v3584_v41, 0 }
 0x507   :  { %3690 = vmatpush.bf16.msra.mxu2 %v3681_v52 }
 0x508   :  { %v3538_v23 = vpop.f32.mrf.mxu2  ;;  %v3552_v26 = vpop.f32.mrf.mxu3 }
 0x509   :  { %v3542_v27 = vpack.c.bf16 %v3538_v23, %v3538_v23  ;;  %v3556_v54 = vpack.c.bf16 %v3552_v26, %v3552_v26 }
 0x50a   :  { %5121 = vmatmul.msk.bf16.vlgmr.msra.gmra.mxu2 %vm2954_vm1, %v5118_v22 }
 0x50b   :  { %v3612_v29 = vsel %vm2958_vm0, %v3542_v27, 0  ;;  %v3633_v30 = vsel %vm2958_vm0, %v3556_v54, 0  ;;  %v3568_v58 = vpop.f32.mrf.mxu0  ;;  %v3582_v32 = vpop.f32.mrf.mxu1 }
 0x50c   :  { %3621 = vmatpush.bf16.msrb.mxu3 %v3612_v29  ;;  %3642 = vmatpush.bf16.msra.mxu0 %v3633_v30 }
 0x50f   :  { %5114 = vmatmul.msk.bf16.vlgmr.msrb.gmra.mxu3 %vm2954_vm1, %v5111_v35  ;;  %5116 = vmatmul.msk.bf16.vlgmr.msra.gmra.mxu0 %vm2954_vm1, %v5115_v1 }
 0x510   :  { %3711 = vmatpush.bf16.msra.mxu3 %v3702_v34  ;;  %v3540_v53 = vpop.f32.mrf.mxu2  ;;  %v3554_v57 = vpop.f32.mrf.mxu3 }
 0x513   :  { %v3673_v9 = vpop.f32.mrf.mxu1 }
 0x518   :  { %v3604_v62 = vpop.f32.mrf.mxu2 }
 0x51b   :  { %v3675_v0 = vpop.f32.mrf.mxu1 }
 0x51f   :  { %5123 = vmatmul.msk.bf16.vlgmr.msra.gmra.mxu3 %vm2954_vm1, %v5122_v61 }
 0x520   :  { %v3606_v63 = vpop.f32.mrf.mxu2 }
 0x58c   :  { %v3644_v3 = vpop.f32.mrf.mxu0 }
 0x58d   :  { %v3692_v4 = vpop.f32.mrf.mxu2 }
 0x58e   :  { %v3693_v17 = vadd.f32 %v3692_v4, %v3673_v9 }
 0x592   :  { %v3623_v42 = vpop.f32.mrf.mxu3 }
 0x593   :  { %v3624_v6 = vadd.f32 %v3623_v42, %v3604_v62 }
 0x594   :  { %v3646_v24 = vpop.f32.mrf.mxu0 }
 0x595   :  { %v3648_v7 = vadd.f32 %v3644_v3, %v3624_v6  ;;  %v3694_v45 = vpop.f32.mrf.mxu2 }
 0x597   :  { %v3656_v8 = vadd.f32 %v3654_v49, %v3648_v7 }
 0x599   :  { %v3728_v11 = vmax.f32 %v3656_v8, 0.0 }
 0x59a   :  { %v3625_v15 = vpop.f32.mrf.mxu3 }
 0x59b   :  { %v3734_v12 = vmin.f32 %v3728_v11, %v3732_v13 }
 0x59d   :  { %v3739_v16 = vpack.c.bf16 %v3734_v12, %v3734_v12 }
 0x59f   :  { %v3766_v19 = vsel %vm2958_vm0, %v3739_v16, 0 }
 0x5a0   :  { %3775 = vmatpush.bf16.msrb.mxu1 %v3766_v19 }
 0x5a2   :  { %v3713_v43 = vpop.f32.mrf.mxu3 }
 0x5a3   :  { %v3717_v40 = vadd.f32 %v3713_v43, %v3693_v17  ;;  %5129 = vmatmul.msk.bf16.vlgmr.msrb.gmra.mxu1 %vm2954_vm1, %v5126_v18 }
 0x5a5   :  { %v3725_v56 = vadd.f32 %v3723_v55, %v3717_v40 }
 0x5a7   :  { %v3735_v59 = vmax.f32 %v3725_v56, 0.0 }
 0x5a9   :  { %v3736_v60 = vmin.f32 %v3735_v59, %v3732_v13 }
 0x5aa   :  { %v3715_v2 = vpop.f32.mrf.mxu3 }
 0x5ab   :  { %v3742_v5 = vpack.c.bf16 %v3736_v60, %v3736_v60 }
 0x5ad   :  { %v3747_v14 = vsel %vm2958_vm0, %v3742_v5, 0 }
 0x5ae   :  { %3756 = vmatpush.bf16.msrb.mxu0 %v3747_v14 }
 0x5b1   :  { %5128 = vmatmul.msk.bf16.vlgmr.msrb.gmra.mxu0 %vm2954_vm1, %v5127_v10 }
 0x620   :  { %v3777_v21 = vpop.f32.mrf.mxu1 }
 0x628   :  { %v3779_v28 = vpop.f32.mrf.mxu1 }
 0x62e   :  { %v3758_v20 = vpop.f32.mrf.mxu0 }
 0x62f   :  { %v3778_v25 = vadd.f32 %v3777_v21, %v3758_v20 }
 0x631   :  { %v3788_v46 = vadd.f32 %v3786_v31, %v3778_v25 }
 0x633   :  { %v3789_v47 = vmax.f32 %v3788_v46, 0.0 }
 0x635   :  { %3790 = vst [vmem:[%s5914_s7] sm:$0xff] %v3789_v47 }
 0x636   :  { %v3760_v33 = vpop.f32.mrf.mxu0 }
 0x637   :  { %3795 = vsyncpa [#allocation3], 1 }
 0x638   :  { %3796 = vsyncpa [#allocation5], 1 }

</bundles_post_ra>
